<compile_context>
chip_gen: v5e
topology: v5e:2x2
jax: 0.10.0
libtpu: 0.0.40
codegen_flags: <defaults>
</compile_context>

<pallas_src>
import functools
import math

import jax
import jax.numpy as jnp
from jax.experimental import pallas as pl
from jax.experimental.pallas import tpu as pltpu


NEG_INF = -1e30  # bias for padded classifier columns: exp underflows to exactly 0.


def _pad_to(v, mult):
    return ((v + mult - 1) // mult) * mult


def _reorder_flags(params):
    """adj@(h@Wl) reorder when padded f_out <= padded f_in (same math, fewer bytes)."""
    return tuple(
        _pad_to(wl.shape[1], 128) <= _pad_to(wl.shape[0], 128) for (wl, _, _) in params
    )


def _tpu_caps():
    """(vmem_capacity_bytes, has_two_tensorcores) with conservative fallbacks."""
    vmem_cap = 64 * 1024 * 1024        # v7x per-core VMEM (smallest current gen)
    try:
        vmem_cap = int(pltpu.get_tpu_info().vmem_capacity_bytes)
    except Exception:
        pass
    two_tc = False
    try:
        two_tc = "v7" in jax.devices()[0].device_kind.lower()
    except Exception:
        pass
    return vmem_cap, two_tc


def _pad_params(params):
    """Pad feature/class widths to multiples of 128 (lane-dense MXU + stores)."""
    f32, bf = jnp.float32, jnp.bfloat16
    L = len(params)
    padded = []
    for li, (wl, wr, b) in enumerate(params):
        f_in, f_out = wl.shape
        f_in_p, f_out_p = _pad_to(f_in, 128), _pad_to(f_out, 128)
        wl_p = jnp.zeros((f_in_p, f_out_p), f32).at[:f_in, :f_out].set(wl).astype(bf)
        wr_p = jnp.zeros((f_in_p, f_out_p), f32).at[:f_in, :f_out].set(wr).astype(bf)
        pad_bias = 0.0 if li < L - 1 else NEG_INF
        b_p = jnp.full((1, f_out_p), pad_bias, f32).at[:, :f_out].set(
            jnp.reshape(b, (1, -1)))
        padded.append((wl_p, wr_p, b_p))
    return padded


def _fused_vmem_bytes(N, f0_p, padded_params):
    """VMEM needed by the fused call (single-buffered adjacency + everything else)."""
    total = N * N * 2                    # adjacency VMEM scratch (one copy, manual DMA)
    total += N * f0_p * 2 + N * 4        # x_b (Buffered(1)) + inv_deg
    fmax = f0_p
    for (wl, wr, b) in padded_params:
        total += wl.size * 2 + wr.size * 2 + b.size * 4
        fmax = max(fmax, wl.shape[0], wl.shape[1])
    total += N * padded_params[-1][0].shape[1] * 4      # f32 output (Buffered(1))
    total += 6 * N * fmax * 4                           # f32/bf16 temporaries headroom
    return total


# ---------------------------------------------------------------------------
# Fused kernel: all layers in one pallas_call (graphs whose adjacency fits VMEM).
# Adjacency comes in via memory_space=pl.ANY and is DMA'd manually so the copy
# overlaps the first layer's adjacency-independent matmuls.
# ---------------------------------------------------------------------------
def _fused_sage_kernel(adj_hbm, invdeg_ref, x_ref, *rest, num_layers, reorder):
    out_ref = rest[3 * num_layers]
    adj_vmem = rest[3 * num_layers + 1]
    adj_sem = rest[3 * num_layers + 2]
    param_refs = rest[:3 * num_layers]
    bf, f32 = jnp.bfloat16, jnp.float32

    # Kick off the (large) adjacency HBM->VMEM DMA first ...
    cp = pltpu.make_async_copy(adj_hbm, adj_vmem, adj_sem)
    cp.start()

    inv_deg = invdeg_ref[...]            # f32  [N, 1]
    h = x_ref[...]                       # bf16 [N, F0p]

    # ... and hide it behind layer-0 work that does not need the adjacency.
    wl0 = param_refs[0][...]
    wr0 = param_refs[1][...]
    self0 = jnp.dot(h, wr0, preferred_element_type=f32)
    z0 = (jnp.dot(h, wl0, preferred_element_type=f32).astype(bf)
          if reorder[0] else None)

    cp.wait()
    adj = adj_vmem[...]                  # bf16 [N, N], exact 0/1

    for li in range(num_layers):
        wl = param_refs[3 * li][...]
        wr = param_refs[3 * li + 1][...]
        b = param_refs[3 * li + 2][...]

        if li == 0:
            selfc, z = self0, z0
        else:
            selfc = jnp.dot(h, wr, preferred_element_type=f32)
            z = (jnp.dot(h, wl, preferred_element_type=f32).astype(bf)
                 if reorder[li] else None)

        if reorder[li]:
            # adj @ (h @ Wl): shrinks the N*N*k matmul inner width to f_out.
            aggl = jnp.dot(adj, z, preferred_element_type=f32)
        else:
            agg = jnp.dot(adj, h, preferred_element_type=f32)
            aggl = jnp.dot(agg.astype(bf), wl, preferred_element_type=f32)

        out = aggl * inv_deg + selfc + b            # mean aggregation, f32 epilogue

        if li < num_layers - 1:
            h = jnp.maximum(out, 0.0).astype(bf)    # ReLU; dropout(eval) = identity
        else:
            m = jnp.max(out, axis=-1, keepdims=True)
            s = out - m
            out_ref[...] = s - jnp.log(jnp.sum(jnp.exp(s), axis=-1, keepdims=True))


def _sage_fused_call(adj_b, inv_deg, x_b, padded_params, reorder, vmem_cap):
    N = adj_b.shape[0]
    L = len(padded_params)
    f_last = padded_params[-1][0].shape[1]

    kernel = functools.partial(_fused_sage_kernel, num_layers=L, reorder=reorder)

    # grid=(1,) cannot pipeline -> single-buffer every auto-DMA'd operand.
    single = pl.Buffered(1)
    in_specs = [
        pl.BlockSpec(memory_space=pl.ANY),                                # adjacency (HBM)
        pl.BlockSpec((N, 1), lambda i: (0, 0), pipeline_mode=single),     # 1/deg
        pl.BlockSpec((N, x_b.shape[1]), lambda i: (0, 0), pipeline_mode=single),
    ]
    flat = []
    for (wl, wr, b) in padded_params:
        in_specs += [
            pl.BlockSpec(wl.shape, lambda i: (0, 0), pipeline_mode=single),
            pl.BlockSpec(wr.shape, lambda i: (0, 0), pipeline_mode=single),
            pl.BlockSpec(b.shape, lambda i: (0, 0), pipeline_mode=single),
        ]
        flat += [wl, wr, b]

    needed = _fused_vmem_bytes(N, x_b.shape[1], padded_params)
    vmem_limit = int(min(0.9 * vmem_cap, max(2 * needed, 32 * 1024 * 1024)))

    return pl.pallas_call(
        kernel,
        out_shape=jax.ShapeDtypeStruct((N, f_last), jnp.float32),
        grid=(1,),
        in_specs=in_specs,
        out_specs=pl.BlockSpec((N, f_last), lambda i: (0, 0), pipeline_mode=single),
        scratch_shapes=[pltpu.VMEM((N, N), jnp.bfloat16),
                        pltpu.SemaphoreType.DMA],
        compiler_params=pltpu.CompilerParams(
            dimension_semantics=("arbitrary",),
            vmem_limit_bytes=vmem_limit),
    )(adj_b, inv_deg, x_b, *flat)


# ---------------------------------------------------------------------------
# Tiled per-layer kernel (row tiles x neighbour-K tiles).  K (reduction) axis is
# last and "arbitrary"; the row axis is "parallel" (megacore sharding on v7x).
# When `reorder` the K-side stream is z = h @ Wl (computed once in the wrapper)
# so the accumulator is only (tm, f_out) and the streamed bytes shrink.
# ---------------------------------------------------------------------------
def _sage_layer_tiled_kernel(adj_ref, k_ref, xi_ref, invdeg_ref, *rest,
                             activation, reorder):
    if reorder:
        wr_ref, b_ref, out_ref, acc_ref = rest
        wl_ref = None
    else:
        wl_ref, wr_ref, b_ref, out_ref, acc_ref = rest

    kk = pl.program_id(1)

    @pl.when(kk == 0)
    def _():
        acc_ref[...] = jnp.zeros_like(acc_ref)

    # accumulate neighbour sums for this row tile (f32 accumulator)
    acc_ref[...] += jnp.dot(adj_ref[...], k_ref[...],
                            preferred_element_type=jnp.float32)

    @pl.when(kk == pl.num_programs(1) - 1)
    def _():
        agg = acc_ref[...] * invdeg_ref[...]                    # mean aggregation
        if reorder:
            h = agg
        else:
            h = jnp.dot(agg.astype(jnp.bfloat16), wl_ref[...],
                        preferred_element_type=jnp.float32)
        h = h + jnp.dot(xi_ref[...], wr_ref[...],
                        preferred_element_type=jnp.float32)
        h = h + b_ref[...]
        if activation == "relu":
            h = jnp.maximum(h, 0.0)                             # dropout = identity
        elif activation == "log_softmax":
            m = jnp.max(h, axis=-1, keepdims=True)
            s = h - m
            h = s - jnp.log(jnp.sum(jnp.exp(s), axis=-1, keepdims=True))
        out_ref[...] = h.astype(out_ref.dtype)


def sage_conv_layer_tiled(adj_b, inv_deg, k_stream_b, xi_b, wl_b, wr_b, b, *,
                          activation, out_dtype, reorder, tm, tk, vmem_limit):
    Np = adj_b.shape[0]
    w_k = k_stream_b.shape[1]          # f_out_p if reorder else f_in_p
    f_in = xi_b.shape[1]
    f_out = wr_b.shape[1]
    grid = (Np // tm, Np // tk)

    kernel = functools.partial(_sage_layer_tiled_kernel,
                               activation=activation, reorder=reorder)

    in_specs = [
        pl.BlockSpec((tm, tk), lambda i, k: (i, k)),        # adjacency tile
        pl.BlockSpec((tk, w_k), lambda i, k: (k, 0)),       # K-side stream (h or h@Wl)
        pl.BlockSpec((tm, f_in), lambda i, k: (i, 0)),      # self features
        pl.BlockSpec((tm, 1), lambda i, k: (i, 0)),         # 1/deg
    ]
    args = [adj_b, k_stream_b, xi_b, inv_deg]
    if not reorder:
        in_specs.append(pl.BlockSpec((f_in, f_out), lambda i, k: (0, 0)))   # W_l
        args.append(wl_b)
    in_specs += [
        pl.BlockSpec((f_in, f_out), lambda i, k: (0, 0)),   # W_r
        pl.BlockSpec((1, f_out), lambda i, k: (0, 0)),      # bias
    ]
    args += [wr_b, b]

    return pl.pallas_call(
        kernel,
        out_shape=jax.ShapeDtypeStruct((Np, f_out), out_dtype),
        grid=grid,
        in_specs=in_specs,
        out_specs=pl.BlockSpec((tm, f_out), lambda i, k: (i, 0)),
        scratch_shapes=[pltpu.VMEM((tm, w_k), jnp.float32)],
        compiler_params=pltpu.CompilerParams(
            dimension_semantics=("parallel", "arbitrary"),
            vmem_limit_bytes=vmem_limit),
    )(*args)


def _run_tiled(adj_b, inv_deg, x_b, padded_params, reorder, tm, tk, vmem_cap):
    bf, f32 = jnp.bfloat16, jnp.float32
    N = adj_b.shape[0]
    L = len(padded_params)

    # Large default tiles (1-4 MiB bf16 adjacency tiles) amortise the per-step
    # overhead and cut the redundant streaming of the K-side features.
    if tm is None:
        tm = min(512, _pad_to(N, 128))
    if tk is None:
        tk = min(1024, _pad_to(N, 128))
    tm = max(8, _pad_to(int(tm), 8))
    tk = max(128, _pad_to(int(tk), 128))

    # Pad N to a tile multiple (padded rows have degree 0 -> inert, sliced later).
    Np = _pad_to(N, math.lcm(tm, tk))
    if Np != N:
        adj_b = jnp.zeros((Np, Np), adj_b.dtype).at[:N, :N].set(adj_b)
        x_b = jnp.zeros((Np, x_b.shape[1]), x_b.dtype).at[:N].set(x_b)
        inv_deg = jnp.zeros((Np, 1), inv_deg.dtype).at[:N].set(inv_deg)

    vmem_limit = int(min(0.75 * vmem_cap, 96 * 1024 * 1024))

    h = x_b
    for li, (wl, wr, b) in enumerate(padded_params):
        last = li == L - 1
        if reorder[li]:
            # adj @ (h @ Wl): stream the (narrower) post-Wl features on the K side.
            k_stream = jnp.dot(h, wl, preferred_element_type=f32).astype(bf)
        else:
            k_stream = h
        h = sage_conv_layer_tiled(
            adj_b, inv_deg, k_stream, h, wl, wr, b,
            activation="log_softmax" if last else "relu",
            out_dtype=f32 if last else bf,
            reorder=reorder[li], tm=tm, tk=tk, vmem_limit=vmem_limit)
    return h


# ---------------------------------------------------------------------------
# Parameters and forward pass
# ---------------------------------------------------------------------------
def init_sage_params(key, nfeat, nhid, nclass, num_layers):
    dims = [nfeat] + [nhid] * (num_layers - 1) + [nclass]
    params = []
    for li in range(num_layers):
        f_in, f_out = dims[li], dims[li + 1]
        k_l, k_r, key = jax.random.split(key, 3)
        scale = 1.0 / jnp.sqrt(jnp.float32(f_in))
        w_l = (jax.random.uniform(k_l, (f_in, f_out), jnp.float32) * 2.0 - 1.0) * scale
        w_r = (jax.random.uniform(k_r, (f_in, f_out), jnp.float32) * 2.0 - 1.0) * scale
        b = jnp.zeros((1, f_out), jnp.float32)
        params.append((w_l, w_r, b))
    return params


def sage_products_forward(x, adj, params, *, force_tiled=False, tm=None, tk=None):
    """Forward pass of SAGE_products (inference: dropout = identity)."""
    f32, bf = jnp.float32, jnp.bfloat16
    N = x.shape[0]
    nclass = params[-1][0].shape[1]

    vmem_cap, two_tc = _tpu_caps()

    adj_b = adj.astype(bf)                                   # 0/1 exact in bf16
    # one-time degree pass (bf16 read, f32 accumulation) amortised over all layers
    deg = jnp.sum(adj_b, axis=-1, dtype=f32, keepdims=True)
    inv_deg = jnp.where(deg > 0.0, 1.0 / deg, 0.0)

    padded = _pad_params(params)
    reorder = _reorder_flags(params)

    f0 = x.shape[1]
    f0_p = _pad_to(f0, 128)
    x_b = jnp.zeros((N, f0_p), f32).at[:, :f0].set(x).astype(bf)

    # generation-aware fused-path budget; prefer the tiled ("parallel" row axis)
    # path on 2-TensorCore chips beyond trivially small N.
    needed = _fused_vmem_bytes(N, f0_p, padded)
    use_fused = (not force_tiled
                 and needed <= int(0.6 * vmem_cap)
                 and not (two_tc and N >= 512))

    out_p = None
    if use_fused:
        try:
            out_p = _sage_fused_call(adj_b, inv_deg, x_b, padded, reorder, vmem_cap)
        except Exception:
            out_p = None          # fall back to the tiled path on this generation
    if out_p is None:
        out_p = _run_tiled(adj_b, inv_deg, x_b, padded, reorder, tm, tk, vmem_cap)

    return out_p[:N, :nclass]


# ---------------------------------------------------------------------------
# References for correctness checks
# ---------------------------------------------------------------------------
def _reference_bf16(x, adj, params, mode):
    """Pure-JAX reference mirroring the kernels' bf16 casting points exactly."""
    bf, f32 = jnp.bfloat16, jnp.float32
    adj_b = adj.astype(bf)
    deg = jnp.sum(adj_b, axis=-1, dtype=f32, keepdims=True)
    inv_deg = jnp.where(deg > 0.0, 1.0 / deg, 0.0)
    flags = _reorder_flags(params)
    h = x.astype(bf)
    L = len(params)
    out = None
    for li, (wl, wr, b) in enumerate(params):
        wl_b, wr_b = wl.astype(bf), wr.astype(bf)
        if flags[li]:
            z = jnp.dot(h, wl_b, preferred_element_type=f32).astype(bf)
            aggl = jnp.dot(adj_b, z, preferred_element_type=f32) * inv_deg
        elif mode == "fused":
            agg = jnp.dot(adj_b, h, preferred_element_type=f32)
            aggl = jnp.dot(agg.astype(bf), wl_b, preferred_element_type=f32) * inv_deg
        else:  # tiled non-reorder: mean applied to the accumulator before lin_l
            agg = jnp.dot(adj_b, h, preferred_element_type=f32) * inv_deg
            aggl = jnp.dot(agg.astype(bf), wl_b, preferred_element_type=f32)
        h_out = aggl + jnp.dot(h, wr_b, preferred_element_type=f32) + b.reshape(1, -1)
        if li < L - 1:
            h = jnp.maximum(h_out, 0.0).astype(bf)
        else:
            out = jax.nn.log_softmax(h_out, axis=-1)
    return out


def _reference_f32(x, adj, params):
    """Pure f32 reference (sanity check on bf16 error)."""
    deg = jnp.sum(adj, axis=-1, keepdims=True)
    inv_deg = jnp.where(deg > 0.0, 1.0 / deg, 0.0)
    h = x
    L = len(params)
    for li, (wl, wr, b) in enumerate(params):
        agg = (adj @ h) * inv_deg
        out = agg @ wl + h @ wr + b.reshape(1, -1)
        if li < L - 1:
            h = jnp.maximum(out, 0.0)
        else:
            return jax.nn.log_softmax(out, axis=-1)


def _check(out, x, adj, params):
    ref_fused = _reference_bf16(x, adj, params, mode="fused")
    ref_tiled = _reference_bf16(x, adj, params, mode="tiled")
    ref_f32 = _reference_f32(x, adj, params)
    err_bf = min(float(jnp.max(jnp.abs(out - ref_fused))),
                 float(jnp.max(jnp.abs(out - ref_tiled))))
    err_f32 = float(jnp.max(jnp.abs(out - ref_f32)))
    assert err_bf < 1e-2, f"bf16-reference mismatch: {err_bf}"
    assert err_f32 < 1e-1, f"f32-reference mismatch: {err_f32}"


if __name__ == "__main__":
    NFEAT, NHID, NCLASS, NUM_LAYERS = 32, 32, 8, 3
    key = jax.random.PRNGKey(0)
    k_x, k_adj, k_par = jax.random.split(key, 3)
    params = init_sage_params(k_par, NFEAT, NHID, NCLASS, NUM_LAYERS)

    def make_graph(kx, ka, n, nfeat, p):
        xg = jax.random.normal(kx, (n, nfeat), jnp.float32)
        a = (jax.random.uniform(ka, (n, n)) < p).astype(jnp.float32)
        adjg = jnp.maximum(a, a.T) * (1.0 - jnp.eye(n, dtype=jnp.float32))  # no self loops
        return xg, adjg

    # --- 1) small graph: fused all-layers-in-one-call path ---
    N = 64
    x, adj = make_graph(k_x, k_adj, N, NFEAT, 0.1)
    out = jax.block_until_ready(sage_products_forward(x, adj, params))
    assert out.shape == (N, NCLASS)
    _check(out, x, adj, params)

    # --- 2) larger graph: tiled (row x neighbour-K) per-layer path, caller tiles ---
    N2 = 256
    k_x2, k_adj2 = jax.random.split(jax.random.PRNGKey(1))
    x2, adj2 = make_graph(k_x2, k_adj2, N2, NFEAT, 0.05)
    out2 = jax.block_until_ready(
        sage_products_forward(x2, adj2, params, force_tiled=True, tm=128, tk=128))
    assert out2.shape == (N2, NCLASS)
    _check(out2, x2, adj2, params)

    # --- 3) non-tile-aligned N + a non-reorder layer (nhid pads wider than nfeat):
    #         exercises the wrapper N-padding and the W_l-in-kernel branch (tiled).
    params2 = init_sage_params(jax.random.PRNGKey(2), 32, 192, 8, 2)
    N3 = 200
    k_x3, k_adj3 = jax.random.split(jax.random.PRNGKey(3))
    x3, adj3 = make_graph(k_x3, k_adj3, N3, 32, 0.05)
    out3 = jax.block_until_ready(
        sage_products_forward(x3, adj3, params2, force_tiled=True))
    assert out3.shape == (N3, 8)
    _check(out3, x3, adj3, params2)

    # --- 4) non-reorder layer through the fused path ---
    out4 = jax.block_until_ready(sage_products_forward(x, adj, params2))
    assert out4.shape == (N, 8)
    _check(out4, x, adj, params2)

    print("KERNEL_OK")
</pallas_src>

<mosaic_0001>
module attributes {stable_mosaic.version = 11 : i64} {
  func.func @_fused_sage_kernel(%arg0: i32, %arg1: memref<64x64xbf16, #tpu.memory_space<any>>, %arg2: memref<64x1xf32, #tpu.memory_space<vmem>>, %arg3: memref<64x128xbf16, #tpu.memory_space<vmem>>, %arg4: memref<128x128xbf16, #tpu.memory_space<vmem>>, %arg5: memref<128x128xbf16, #tpu.memory_space<vmem>>, %arg6: memref<1x128xf32, #tpu.memory_space<vmem>>, %arg7: memref<128x128xbf16, #tpu.memory_space<vmem>>, %arg8: memref<128x128xbf16, #tpu.memory_space<vmem>>, %arg9: memref<1x128xf32, #tpu.memory_space<vmem>>, %arg10: memref<128x128xbf16, #tpu.memory_space<vmem>>, %arg11: memref<128x128xbf16, #tpu.memory_space<vmem>>, %arg12: memref<1x128xf32, #tpu.memory_space<vmem>>, %arg13: memref<64x128xf32, #tpu.memory_space<vmem>>, %arg14: memref<64x64xbf16, #tpu.memory_space<vmem>>, %arg15: memref<!tpu.dma_semaphore, #tpu.memory_space<semaphore_mem>>) attributes {dimension_semantics = [#tpu.dimension_semantics<arbitrary>], iteration_bounds = array<i64: 1>, scalar_prefetch = 0 : i64, scratch_operands = 2 : i64, tpu.core_type = #tpu.core_type<tc>, window_params = [{}, {pipeline_mode = #tpu.pipeline_mode<synchronous>, transform_indices = @transform_1, window_bounds = array<i64: 64, 1>}, {pipeline_mode = #tpu.pipeline_mode<synchronous>, transform_indices = @transform_2, window_bounds = array<i64: 64, 128>}, {pipeline_mode = #tpu.pipeline_mode<synchronous>, transform_indices = @transform_3, window_bounds = array<i64: 128, 128>}, {pipeline_mode = #tpu.pipeline_mode<synchronous>, transform_indices = @transform_4, window_bounds = array<i64: 128, 128>}, {pipeline_mode = #tpu.pipeline_mode<synchronous>, transform_indices = @transform_5, window_bounds = array<i64: 1, 128>}, {pipeline_mode = #tpu.pipeline_mode<synchronous>, transform_indices = @transform_6, window_bounds = array<i64: 128, 128>}, {pipeline_mode = #tpu.pipeline_mode<synchronous>, transform_indices = @transform_7, window_bounds = array<i64: 128, 128>}, {pipeline_mode = #tpu.pipeline_mode<synchronous>, transform_indices = @transform_8, window_bounds = array<i64: 1, 128>}, {pipeline_mode = #tpu.pipeline_mode<synchronous>, transform_indices = @transform_9, window_bounds = array<i64: 128, 128>}, {pipeline_mode = #tpu.pipeline_mode<synchronous>, transform_indices = @transform_10, window_bounds = array<i64: 128, 128>}, {pipeline_mode = #tpu.pipeline_mode<synchronous>, transform_indices = @transform_11, window_bounds = array<i64: 1, 128>}, {pipeline_mode = #tpu.pipeline_mode<synchronous>, transform_indices = @transform_12, window_bounds = array<i64: 64, 128>}]} {
    tpu.enqueue_dma source(%arg1 : memref<64x64xbf16, #tpu.memory_space<any>>) target(%arg14 : memref<64x64xbf16, #tpu.memory_space<vmem>>) target_semaphore(%arg15 : memref<!tpu.dma_semaphore, #tpu.memory_space<semaphore_mem>>)
    %c0 = arith.constant 0 : index
    %c0_0 = arith.constant 0 : index
    %0 = vector.load %arg2[%c0, %c0_0] : memref<64x1xf32, #tpu.memory_space<vmem>>, vector<64x1xf32>
    %c0_1 = arith.constant 0 : index
    %c0_2 = arith.constant 0 : index
    %1 = vector.load %arg3[%c0_1, %c0_2] : memref<64x128xbf16, #tpu.memory_space<vmem>>, vector<64x128xbf16>
    %c0_3 = arith.constant 0 : index
    %c0_4 = arith.constant 0 : index
    %2 = vector.load %arg4[%c0_3, %c0_4] : memref<128x128xbf16, #tpu.memory_space<vmem>>, vector<128x128xbf16>
    %c0_5 = arith.constant 0 : index
    %c0_6 = arith.constant 0 : index
    %3 = vector.load %arg5[%c0_5, %c0_6] : memref<128x128xbf16, #tpu.memory_space<vmem>>, vector<128x128xbf16>
    %cst = arith.constant dense<0.000000e+00> : vector<64x128xf32>
    %4 = tpu.matmul %1, %3, %cst {dimension_numbers = #tpu.dot_dimension_numbers<[1], [0], [0], [1], [0, 0, 1, 1], [], []>} : vector<64x128xbf16>, vector<128x128xbf16>, vector<64x128xf32> -> vector<64x128xf32>
    %cst_7 = arith.constant dense<0.000000e+00> : vector<64x128xf32>
    %5 = tpu.matmul %1, %2, %cst_7 {dimension_numbers = #tpu.dot_dimension_numbers<[1], [0], [0], [1], [0, 0, 1, 1], [], []>} : vector<64x128xbf16>, vector<128x128xbf16>, vector<64x128xf32> -> vector<64x128xf32>
    %6 = arith.truncf %5 : vector<64x128xf32> to vector<64x128xbf16>
    tpu.wait_dma2 semaphore(%arg15 : memref<!tpu.dma_semaphore, #tpu.memory_space<semaphore_mem>>) src(%arg1 : memref<64x64xbf16, #tpu.memory_space<any>>) dst(%arg14 : memref<64x64xbf16, #tpu.memory_space<vmem>>)
    %c0_8 = arith.constant 0 : index
    %c0_9 = arith.constant 0 : index
    %7 = vector.load %arg14[%c0_8, %c0_9] : memref<64x64xbf16, #tpu.memory_space<vmem>>, vector<64x64xbf16>
    %c0_10 = arith.constant 0 : index
    %c0_11 = arith.constant 0 : index
    %8 = vector.load %arg6[%c0_10, %c0_11] : memref<1x128xf32, #tpu.memory_space<vmem>>, vector<1x128xf32>
    %cst_12 = arith.constant dense<0.000000e+00> : vector<64x128xf32>
    %9 = tpu.matmul %7, %6, %cst_12 {dimension_numbers = #tpu.dot_dimension_numbers<[1], [0], [0], [1], [0, 0, 1, 1], [], []>} : vector<64x64xbf16>, vector<64x128xbf16>, vector<64x128xf32> -> vector<64x128xf32>
    %10 = vector.broadcast %0 : vector<64x1xf32> to vector<64x128xf32>
    %11 = arith.mulf %9, %10 : vector<64x128xf32>
    %12 = arith.addf %11, %4 : vector<64x128xf32>
    %13 = vector.broadcast %8 : vector<1x128xf32> to vector<64x128xf32>
    %14 = arith.addf %12, %13 : vector<64x128xf32>
    %cst_13 = arith.constant 0.000000e+00 : f32
    %15 = vector.broadcast %cst_13 : f32 to vector<64x128xf32>
    %16 = arith.maximumf %14, %15 : vector<64x128xf32>
    %17 = arith.truncf %16 : vector<64x128xf32> to vector<64x128xbf16>
    %c0_14 = arith.constant 0 : index
    %c0_15 = arith.constant 0 : index
    %18 = vector.load %arg7[%c0_14, %c0_15] : memref<128x128xbf16, #tpu.memory_space<vmem>>, vector<128x128xbf16>
    %c0_16 = arith.constant 0 : index
    %c0_17 = arith.constant 0 : index
    %19 = vector.load %arg8[%c0_16, %c0_17] : memref<128x128xbf16, #tpu.memory_space<vmem>>, vector<128x128xbf16>
    %c0_18 = arith.constant 0 : index
    %c0_19 = arith.constant 0 : index
    %20 = vector.load %arg9[%c0_18, %c0_19] : memref<1x128xf32, #tpu.memory_space<vmem>>, vector<1x128xf32>
    %cst_20 = arith.constant dense<0.000000e+00> : vector<64x128xf32>
    %21 = tpu.matmul %17, %19, %cst_20 {dimension_numbers = #tpu.dot_dimension_numbers<[1], [0], [0], [1], [0, 0, 1, 1], [], []>} : vector<64x128xbf16>, vector<128x128xbf16>, vector<64x128xf32> -> vector<64x128xf32>
    %cst_21 = arith.constant dense<0.000000e+00> : vector<64x128xf32>
    %22 = tpu.matmul %17, %18, %cst_21 {dimension_numbers = #tpu.dot_dimension_numbers<[1], [0], [0], [1], [0, 0, 1, 1], [], []>} : vector<64x128xbf16>, vector<128x128xbf16>, vector<64x128xf32> -> vector<64x128xf32>
    %23 = arith.truncf %22 : vector<64x128xf32> to vector<64x128xbf16>
    %cst_22 = arith.constant dense<0.000000e+00> : vector<64x128xf32>
    %24 = tpu.matmul %7, %23, %cst_22 {dimension_numbers = #tpu.dot_dimension_numbers<[1], [0], [0], [1], [0, 0, 1, 1], [], []>} : vector<64x64xbf16>, vector<64x128xbf16>, vector<64x128xf32> -> vector<64x128xf32>
    %25 = vector.broadcast %0 : vector<64x1xf32> to vector<64x128xf32>
    %26 = arith.mulf %24, %25 : vector<64x128xf32>
    %27 = arith.addf %26, %21 : vector<64x128xf32>
    %28 = vector.broadcast %20 : vector<1x128xf32> to vector<64x128xf32>
    %29 = arith.addf %27, %28 : vector<64x128xf32>
    %cst_23 = arith.constant 0.000000e+00 : f32
    %30 = vector.broadcast %cst_23 : f32 to vector<64x128xf32>
    %31 = arith.maximumf %29, %30 : vector<64x128xf32>
    %32 = arith.truncf %31 : vector<64x128xf32> to vector<64x128xbf16>
    %c0_24 = arith.constant 0 : index
    %c0_25 = arith.constant 0 : index
    %33 = vector.load %arg10[%c0_24, %c0_25] : memref<128x128xbf16, #tpu.memory_space<vmem>>, vector<128x128xbf16>
    %c0_26 = arith.constant 0 : index
    %c0_27 = arith.constant 0 : index
    %34 = vector.load %arg11[%c0_26, %c0_27] : memref<128x128xbf16, #tpu.memory_space<vmem>>, vector<128x128xbf16>
    %c0_28 = arith.constant 0 : index
    %c0_29 = arith.constant 0 : index
    %35 = vector.load %arg12[%c0_28, %c0_29] : memref<1x128xf32, #tpu.memory_space<vmem>>, vector<1x128xf32>
    %cst_30 = arith.constant dense<0.000000e+00> : vector<64x128xf32>
    %36 = tpu.matmul %32, %34, %cst_30 {dimension_numbers = #tpu.dot_dimension_numbers<[1], [0], [0], [1], [0, 0, 1, 1], [], []>} : vector<64x128xbf16>, vector<128x128xbf16>, vector<64x128xf32> -> vector<64x128xf32>
    %cst_31 = arith.constant dense<0.000000e+00> : vector<64x128xf32>
    %37 = tpu.matmul %32, %33, %cst_31 {dimension_numbers = #tpu.dot_dimension_numbers<[1], [0], [0], [1], [0, 0, 1, 1], [], []>} : vector<64x128xbf16>, vector<128x128xbf16>, vector<64x128xf32> -> vector<64x128xf32>
    %38 = arith.truncf %37 : vector<64x128xf32> to vector<64x128xbf16>
    %cst_32 = arith.constant dense<0.000000e+00> : vector<64x128xf32>
    %39 = tpu.matmul %7, %38, %cst_32 {dimension_numbers = #tpu.dot_dimension_numbers<[1], [0], [0], [1], [0, 0, 1, 1], [], []>} : vector<64x64xbf16>, vector<64x128xbf16>, vector<64x128xf32> -> vector<64x128xf32>
    %40 = vector.broadcast %0 : vector<64x1xf32> to vector<64x128xf32>
    %41 = arith.mulf %39, %40 : vector<64x128xf32>
    %42 = arith.addf %41, %36 : vector<64x128xf32>
    %43 = vector.broadcast %35 : vector<1x128xf32> to vector<64x128xf32>
    %44 = arith.addf %42, %43 : vector<64x128xf32>
    %cst_33 = arith.constant dense<0xFF800000> : vector<64xf32>
    %45 = vector.multi_reduction <maximumf>, %44, %cst_33 [1] : vector<64x128xf32> to vector<64xf32>
    %46 = vector.shape_cast %45 : vector<64xf32> to vector<64x1xf32>
    %47 = vector.broadcast %46 : vector<64x1xf32> to vector<64x128xf32>
    %48 = arith.subf %44, %47 : vector<64x128xf32>
    %49 = math.exp %48 : vector<64x128xf32>
    %cst_34 = arith.constant dense<0.000000e+00> : vector<64xf32>
    %50 = vector.multi_reduction <add>, %49, %cst_34 [1] : vector<64x128xf32> to vector<64xf32>
    %51 = vector.shape_cast %50 : vector<64xf32> to vector<64x1xf32>
    %52 = math.log %51 : vector<64x1xf32>
    %53 = vector.broadcast %52 : vector<64x1xf32> to vector<64x128xf32>
    %54 = arith.subf %48, %53 : vector<64x128xf32>
    %c0_35 = arith.constant 0 : index
    %c0_36 = arith.constant 0 : index
    %55 = vector.load %arg13[%c0_35, %c0_36] : memref<64x128xf32, #tpu.memory_space<vmem>>, vector<64x128xf32>
    tpu.vector_store %arg13[%c0_35, %c0_36], %54 {strides = array<i32>} : memref<64x128xf32, #tpu.memory_space<vmem>>, vector<64x128xf32>,
    return
  }
  func.func @transform_1(%arg0: i32) -> (i32, i32) {
    %c0_i32 = arith.constant 0 : i32
    %c0_i32_0 = arith.constant 0 : i32
    %c0_i32_1 = arith.constant 0 : i32
    return %c0_i32, %c0_i32_0 : i32, i32
  }
  func.func @transform_2(%arg0: i32) -> (i32, i32) {
    %c0_i32 = arith.constant 0 : i32
    %c0_i32_0 = arith.constant 0 : i32
    %c0_i32_1 = arith.constant 0 : i32
    return %c0_i32, %c0_i32_0 : i32, i32
  }
  func.func @transform_3(%arg0: i32) -> (i32, i32) {
    %c0_i32 = arith.constant 0 : i32
    %c0_i32_0 = arith.constant 0 : i32
    %c0_i32_1 = arith.constant 0 : i32
    return %c0_i32, %c0_i32_0 : i32, i32
  }
  func.func @transform_4(%arg0: i32) -> (i32, i32) {
    %c0_i32 = arith.constant 0 : i32
    %c0_i32_0 = arith.constant 0 : i32
    %c0_i32_1 = arith.constant 0 : i32
    return %c0_i32, %c0_i32_0 : i32, i32
  }
  func.func @transform_5(%arg0: i32) -> (i32, i32) {
    %c0_i32 = arith.constant 0 : i32
    %c0_i32_0 = arith.constant 0 : i32
    %c0_i32_1 = arith.constant 0 : i32
    return %c0_i32, %c0_i32_0 : i32, i32
  }
  func.func @transform_6(%arg0: i32) -> (i32, i32) {
    %c0_i32 = arith.constant 0 : i32
    %c0_i32_0 = arith.constant 0 : i32
    %c0_i32_1 = arith.constant 0 : i32
    return %c0_i32, %c0_i32_0 : i32, i32
  }
  func.func @transform_7(%arg0: i32) -> (i32, i32) {
    %c0_i32 = arith.constant 0 : i32
    %c0_i32_0 = arith.constant 0 : i32
    %c0_i32_1 = arith.constant 0 : i32
    return %c0_i32, %c0_i32_0 : i32, i32
  }
  func.func @transform_8(%arg0: i32) -> (i32, i32) {
    %c0_i32 = arith.constant 0 : i32
    %c0_i32_0 = arith.constant 0 : i32
    %c0_i32_1 = arith.constant 0 : i32
    return %c0_i32, %c0_i32_0 : i32, i32
  }
  func.func @transform_9(%arg0: i32) -> (i32, i32) {
    %c0_i32 = arith.constant 0 : i32
    %c0_i32_0 = arith.constant 0 : i32
    %c0_i32_1 = arith.constant 0 : i32
    return %c0_i32, %c0_i32_0 : i32, i32
  }
  func.func @transform_10(%arg0: i32) -> (i32, i32) {
    %c0_i32 = arith.constant 0 : i32
    %c0_i32_0 = arith.constant 0 : i32
    %c0_i32_1 = arith.constant 0 : i32
    return %c0_i32, %c0_i32_0 : i32, i32
  }
  func.func @transform_11(%arg0: i32) -> (i32, i32) {
    %c0_i32 = arith.constant 0 : i32
    %c0_i32_0 = arith.constant 0 : i32
    %c0_i32_1 = arith.constant 0 : i32
    return %c0_i32, %c0_i32_0 : i32, i32
  }
  func.func @transform_12(%arg0: i32) -> (i32, i32) {
    %c0_i32 = arith.constant 0 : i32
    %c0_i32_0 = arith.constant 0 : i32
    %c0_i32_1 = arith.constant 0 : i32
    return %c0_i32, %c0_i32_0 : i32, i32
  }
}

module attributes {stable_mosaic.version = 11 : i64} {
  func.func @_sage_layer_tiled_kernel(%arg0: i32, %arg1: i32, %arg2: memref<128x128xbf16, #tpu.memory_space<vmem>>, %arg3: memref<128x128xbf16, #tpu.memory_space<vmem>>, %arg4: memref<128x128xbf16, #tpu.memory_space<vmem>>, %arg5: memref<128x1xf32, #tpu.memory_space<vmem>>, %arg6: memref<128x128xbf16, #tpu.memory_space<vmem>>, %arg7: memref<1x128xf32, #tpu.memory_space<vmem>>, %arg8: memref<128x128xbf16, #tpu.memory_space<vmem>>, %arg9: memref<128x128xf32, #tpu.memory_space<vmem>>) attributes {dimension_semantics = [#tpu.dimension_semantics<parallel>, #tpu.dimension_semantics<arbitrary>], iteration_bounds = array<i64: 1, 1>, scalar_prefetch = 0 : i64, scratch_operands = 1 : i64, tpu.core_type = #tpu.core_type<tc>, window_params = [{transform_indices = @transform_0, window_bounds = array<i64: 128, 128>}, {transform_indices = @transform_1, window_bounds = array<i64: 128, 128>}, {transform_indices = @transform_2, window_bounds = array<i64: 128, 128>}, {transform_indices = @transform_3, window_bounds = array<i64: 128, 1>}, {pipeline_mode = #tpu.pipeline_mode<synchronous>, transform_indices = @transform_4, window_bounds = array<i64: 128, 128>}, {pipeline_mode = #tpu.pipeline_mode<synchronous>, transform_indices = @transform_5, window_bounds = array<i64: 1, 128>}, {transform_indices = @transform_6, window_bounds = array<i64: 128, 128>}]} {
    %c0_i32 = arith.constant 0 : i32
    %0 = arith.cmpi eq, %arg1, %c0_i32 : i32
    %1 = arith.extui %0 : i1 to i32
    %c0_i32_0 = arith.constant 0 : i32
    %2 = arith.cmpi ne, %1, %c0_i32_0 : i32
    scf.if %2 {
      %cst_10 = arith.constant 0.000000e+00 : f32
      %12 = vector.broadcast %cst_10 : f32 to vector<128x128xf32>
      %c0_11 = arith.constant 0 : index
      %c0_12 = arith.constant 0 : index
      %13 = vector.load %arg9[%c0_11, %c0_12] : memref<128x128xf32, #tpu.memory_space<vmem>>, vector<128x128xf32>
      tpu.vector_store %arg9[%c0_11, %c0_12], %12 {strides = array<i32>} : memref<128x128xf32, #tpu.memory_space<vmem>>, vector<128x128xf32>,
    } else {
    }
    %c0 = arith.constant 0 : index
    %c0_1 = arith.constant 0 : index
    %3 = vector.load %arg9[%c0, %c0_1] : memref<128x128xf32, #tpu.memory_space<vmem>>, vector<128x128xf32>
    %c0_2 = arith.constant 0 : index
    %c0_3 = arith.constant 0 : index
    %4 = vector.load %arg2[%c0_2, %c0_3] : memref<128x128xbf16, #tpu.memory_space<vmem>>, vector<128x128xbf16>
    %c0_4 = arith.constant 0 : index
    %c0_5 = arith.constant 0 : index
    %5 = vector.load %arg3[%c0_4, %c0_5] : memref<128x128xbf16, #tpu.memory_space<vmem>>, vector<128x128xbf16>
    %cst = arith.constant dense<0.000000e+00> : vector<128x128xf32>
    %6 = tpu.matmul %4, %5, %cst {dimension_numbers = #tpu.dot_dimension_numbers<[1], [0], [0], [1], [0, 0, 1, 1], [], []>} : vector<128x128xbf16>, vector<128x128xbf16>, vector<128x128xf32> -> vector<128x128xf32>
    %7 = arith.addf %3, %6 : vector<128x128xf32>
    %c0_6 = arith.constant 0 : index
    %c0_7 = arith.constant 0 : index
    %8 = vector.load %arg9[%c0_6, %c0_7] : memref<128x128xf32, #tpu.memory_space<vmem>>, vector<128x128xf32>
    tpu.vector_store %arg9[%c0_6, %c0_7], %7 {strides = array<i32>} : memref<128x128xf32, #tpu.memory_space<vmem>>, vector<128x128xf32>,
    %c0_i32_8 = arith.constant 0 : i32
    %9 = arith.cmpi eq, %arg1, %c0_i32_8 : i32
    %10 = arith.extui %9 : i1 to i32
    %c0_i32_9 = arith.constant 0 : i32
    %11 = arith.cmpi ne, %10, %c0_i32_9 : i32
    scf.if %11 {
      %c0_10 = arith.constant 0 : index
      %c0_11 = arith.constant 0 : index
      %12 = vector.load %arg9[%c0_10, %c0_11] : memref<128x128xf32, #tpu.memory_space<vmem>>, vector<128x128xf32>
      %c0_12 = arith.constant 0 : index
      %c0_13 = arith.constant 0 : index
      %13 = vector.load %arg5[%c0_12, %c0_13] : memref<128x1xf32, #tpu.memory_space<vmem>>, vector<128x1xf32>
      %14 = vector.broadcast %13 : vector<128x1xf32> to vector<128x128xf32>
      %15 = arith.mulf %12, %14 : vector<128x128xf32>
      %c0_14 = arith.constant 0 : index
      %c0_15 = arith.constant 0 : index
      %16 = vector.load %arg4[%c0_14, %c0_15] : memref<128x128xbf16, #tpu.memory_space<vmem>>, vector<128x128xbf16>
      %c0_16 = arith.constant 0 : index
      %c0_17 = arith.constant 0 : index
      %17 = vector.load %arg6[%c0_16, %c0_17] : memref<128x128xbf16, #tpu.memory_space<vmem>>, vector<128x128xbf16>
      %cst_18 = arith.constant dense<0.000000e+00> : vector<128x128xf32>
      %18 = tpu.matmul %16, %17, %cst_18 {dimension_numbers = #tpu.dot_dimension_numbers<[1], [0], [0], [1], [0, 0, 1, 1], [], []>} : vector<128x128xbf16>, vector<128x128xbf16>, vector<128x128xf32> -> vector<128x128xf32>
      %19 = arith.addf %15, %18 : vector<128x128xf32>
      %c0_19 = arith.constant 0 : index
      %c0_20 = arith.constant 0 : index
      %20 = vector.load %arg7[%c0_19, %c0_20] : memref<1x128xf32, #tpu.memory_space<vmem>>, vector<1x128xf32>
      %21 = vector.broadcast %20 : vector<1x128xf32> to vector<128x128xf32>
      %22 = arith.addf %19, %21 : vector<128x128xf32>
      %cst_21 = arith.constant 0.000000e+00 : f32
      %23 = vector.broadcast %cst_21 : f32 to vector<128x128xf32>
      %24 = arith.maximumf %22, %23 : vector<128x128xf32>
      %25 = arith.truncf %24 : vector<128x128xf32> to vector<128x128xbf16>
      %c0_22 = arith.constant 0 : index
      %c0_23 = arith.constant 0 : index
      %26 = vector.load %arg8[%c0_22, %c0_23] : memref<128x128xbf16, #tpu.memory_space<vmem>>, vector<128x128xbf16>
      tpu.vector_store %arg8[%c0_22, %c0_23], %25 {strides = array<i32>} : memref<128x128xbf16, #tpu.memory_space<vmem>>, vector<128x128xbf16>,
    } else {
    }
    return
  }
  func.func @transform_0(%arg0: i32, %arg1: i32) -> (i32, i32) {
    %c0_i32 = arith.constant 0 : i32
    return %arg0, %arg1 : i32, i32
  }
  func.func @transform_1(%arg0: i32, %arg1: i32) -> (i32, i32) {
    %c0_i32 = arith.constant 0 : i32
    %c0_i32_0 = arith.constant 0 : i32
    return %arg1, %c0_i32 : i32, i32
  }
  func.func @transform_2(%arg0: i32, %arg1: i32) -> (i32, i32) {
    %c0_i32 = arith.constant 0 : i32
    %c0_i32_0 = arith.constant 0 : i32
    return %arg0, %c0_i32 : i32, i32
  }
  func.func @transform_3(%arg0: i32, %arg1: i32) -> (i32, i32) {
    %c0_i32 = arith.constant 0 : i32
    %c0_i32_0 = arith.constant 0 : i32
    return %arg0, %c0_i32 : i32, i32
  }
  func.func @transform_4(%arg0: i32, %arg1: i32) -> (i32, i32) {
    %c0_i32 = arith.constant 0 : i32
    %c0_i32_0 = arith.constant 0 : i32
    %c0_i32_1 = arith.constant 0 : i32
    return %c0_i32, %c0_i32_0 : i32, i32
  }
  func.func @transform_5(%arg0: i32, %arg1: i32) -> (i32, i32) {
    %c0_i32 = arith.constant 0 : i32
    %c0_i32_0 = arith.constant 0 : i32
    %c0_i32_1 = arith.constant 0 : i32
    return %c0_i32, %c0_i32_0 : i32, i32
  }
  func.func @transform_6(%arg0: i32, %arg1: i32) -> (i32, i32) {
    %c0_i32 = arith.constant 0 : i32
    %c0_i32_0 = arith.constant 0 : i32
    return %arg0, %c0_i32 : i32, i32
  }
}

</mosaic_0001>

<bundles_post_ra>
// kernel: tpu_custom_call.1
= control target key start
LH: loop header
LB: loop body
LE: loop exit
PB: predicated region body
PF: predicated region fallthrough
CT: control target
= control target key end

     0   :  { %17 = vsyncpa [#allocation5], 0  ;;  %s2003_s0 = inlined_call_operand.hbm [shape: bf16[64,64], index: 0, kind: input, shape index: {}]   ;;  %s2004_s1 = inlined_call_operand.vmem [shape: f32[64,1], index: 1, kind: input, shape index: {}]   ;;  %s2005_s2 = inlined_call_operand.hbm [shape: bf16[64,128], index: 2, kind: input, shape index: {}]   ;;  %s2006_s3 = inlined_call_operand.vmem [shape: bf16[128,128], index: 3, kind: input, shape index: {}]   ;;  %s2007_s4 = inlined_call_operand.hbm [shape: bf16[128,128], index: 4, kind: input, shape index: {}]   ;;  %s2008_s5 = inlined_call_operand.vmem [shape: f32[1,128], index: 5, kind: input, shape index: {}]   ;;  %s2009_s6 = inlined_call_operand.hbm [shape: bf16[128,128], index: 6, kind: input, shape index: {}]   ;;  %s2010_s7 = inlined_call_operand.hbm [shape: bf16[128,128], index: 7, kind: input, shape index: {}]   ;;  %s2011_s8 = inlined_call_operand.vmem [shape: f32[1,128], index: 8, kind: input, shape index: {}]   ;;  %s2012_s9 = inlined_call_operand.hbm [shape: bf16[128,128], index: 9, kind: input, shape index: {}]   ;;  %s2013_s10 = inlined_call_operand.hbm [shape: bf16[128,128], index: 10, kind: input, shape index: {}]   ;;  %s2014_s11 = inlined_call_operand.vmem [shape: f32[1,128], index: 11, kind: input, shape index: {}]   ;;  %s2015_s12 = inlined_call_operand.hbm [shape: f32[64,128], index: 12, kind: output, shape index: {}]  }
   0x1   :  { %18 = vsyncpa [#allocation8], 0 }
   0x2   :  { %19 = vsyncpa [#allocation11], 0 }
   0x3   :  { %20 = vsyncpa [#allocation14], 0 }
   0x4   :  { %21 = vsyncpa [#allocation6], 0  ;;  %s43_s23 = sshll.u32 %s2007_s4, 4  ;;  %s1706_s24 = smov [#allocation7]   ;;  %s44_s23 = int_to_ptr.hbm [resolvable:$true] %s43_s23 }
   0x5   :  { %s45_s25 = sshll.u32 %s1706_s24, 4  ;;  %s71_s28 = sshll.u32 %s2010_s7, 4  ;;  %s46_s25 = int_to_ptr.vmem [resolvable:$true] %s45_s25  ;;  %s72_s28 = int_to_ptr.hbm [resolvable:$true] %s71_s28 }
   0x6   :  { %s1707_s29 = smov 64   ;;  %s1708_s30 = smov 4  }
   0x7   :  { %51 = dma.hbm_to_vmem [thread:$0]  %s44_s23, 1024, %s46_s25, [#allocation8], %s1707_s29, %s1707_s29, %s1708_s30  }
   0x8   :  { %s1709_s13 = smov [#allocation10]   ;;  %s28_s4 = sshll.u32 %s2005_s2, 4  ;;  %s29_s4 = int_to_ptr.hbm [resolvable:$true] %s28_s4 }
   0x9   :  { %s73_s14 = sshll.u32 %s1709_s13, 4  ;;  %s58_s18 = sshll.u32 %s2009_s6, 4  ;;  %s74_s14 = int_to_ptr.vmem [resolvable:$true] %s73_s14  ;;  %s59_s18 = int_to_ptr.hbm [resolvable:$true] %s58_s18 }
   0xa   :  { %79 = dma.hbm_to_vmem [thread:$0]  %s72_s28, 1024, %s74_s14, [#allocation11], %s1707_s29, %s1707_s29, %s1708_s30  }
   0xb   :  { %s1710_s19 = smov [#allocation4]   ;;  %s1711_s21 = smov [#allocation9]  }
   0xc   :  { %s30_s20 = sshll.u32 %s1710_s19, 4  ;;  %s60_s2 = sshll.u32 %s1711_s21, 4  ;;  %s31_s20 = int_to_ptr.vmem [resolvable:$true] %s30_s20  ;;  %s61_s2 = int_to_ptr.vmem [resolvable:$true] %s60_s2 }
   0xd   :  { %36 = dma.hbm_to_vmem [thread:$0]  %s29_s4, 512, %s31_s20, [#allocation5], %s1707_s29, %s1707_s29, %s1708_s30  }
   0xe   :  { %s86_s24 = sshll.u32 %s2012_s9, 4  ;;  %s99_s26 = sshll.u32 %s2013_s10, 4  ;;  %s87_s24 = int_to_ptr.hbm [resolvable:$true] %s86_s24  ;;  %s100_s26 = int_to_ptr.hbm [resolvable:$true] %s99_s26 }
   0xf   :  { %66 = dma.hbm_to_vmem [thread:$0]  %s59_s18, 1024, %s61_s2, [#allocation8], %s1707_s29, %s1707_s29, %s1708_s30  }
  0x10   :  { %s1712_s27 = smov [#allocation12]   ;;  %s1713_s13 = smov [#allocation13]  }
  0x11   :  { %s88_s28 = sshll.u32 %s1712_s27, 4  ;;  %s101_s9 = sshll.u32 %s1713_s13, 4  ;;  %s89_s28 = int_to_ptr.vmem [resolvable:$true] %s88_s28  ;;  %s102_s9 = int_to_ptr.vmem [resolvable:$true] %s101_s9 }
  0x12   :  { %94 = dma.hbm_to_vmem [thread:$0]  %s87_s24, 1024, %s89_s28, [#allocation11], %s1707_s29, %s1707_s29, %s1708_s30  }
  0x13   :  { %107 = dma.hbm_to_vmem [thread:$0]  %s100_s26, 1024, %s102_s9, [#allocation14], %s1707_s29, %s1707_s29, %s1708_s30  }
  0x14   :  { %1694 = dma.done.wait [#allocation5], 512  }
  0x15   :  { %1695 = vsyncadd [#allocation5], 4294966784 }
  0x16   :  { %1696 = dma.done.wait [#allocation8], 2048  }
  0x17   :  { %1697 = vsyncadd [#allocation8], 4294965248 }
  0x18   :  { %1698 = dma.done.wait [#allocation11], 2048  }
  0x19   :  { %1699 = vsyncadd [#allocation11], 4294965248 }
  0x1a   :  { %1700 = dma.done.wait [#allocation14], 1024  }
  0x1b   :  { %1701 = vsyncadd [#allocation14], 4294966272  ;;  %v1823_v0 = vld [vmem:[%s2004_s1] sm:$0xff]  ;;  %v1828_v1 = vld [vmem:[%s2004_s1 + $0x8] sm:$0xff]  ;;  %s142_s18 = sshll.u32 %s2003_s0, 4  ;;  %s1714_s19 = smov [#allocation2]   ;;  %s143_s18 = int_to_ptr.hbm [resolvable:$true] %s142_s18 }
  0x1c   :  { %v1833_v2 = vld [vmem:[%s2004_s1 + $0x10] sm:$0xff]  ;;  %v1838_v3 = vld [vmem:[%s2004_s1 + $0x18] sm:$0xff]  ;;  %v1843_v4 = vld [vmem:[%s2004_s1 + $0x20] sm:$0xff] }
  0x1d   :  { %v1848_v5 = vld [vmem:[%s2004_s1 + $0x28] sm:$0xff]  ;;  %v1853_v6 = vld [vmem:[%s2004_s1 + $0x30] sm:$0xff]  ;;  %v1858_v7 = vld [vmem:[%s2004_s1 + $0x38] sm:$0xff] }
  0x1e   :  { %v1410_v8 = vld [vmem:[#allocation7 + $0x38] sm:$0xff]  ;;  %v1409_v10 = vld [vmem:[#allocation7 + $0x30] sm:$0xff]  ;;  %v1408_v12 = vld [vmem:[#allocation7 + $0x28] sm:$0xff] }
  0x1f   :  { %v1402_v9 = vld [vmem:[%s2006_s3 + $0x38] sm:$0xff]  ;;  %268 = vmatpush.bf16.msra.mxu0 %v1410_v8  ;;  %v1401_v11 = vld [vmem:[%s2006_s3 + $0x30] sm:$0xff]  ;;  %v1400_v13 = vld [vmem:[%s2006_s3 + $0x28] sm:$0xff] }
  0x20   :  { %345 = vmatpush.bf16.msra.mxu1 %v1402_v9  ;;  %v1407_v14 = vld [vmem:[#allocation7 + $0x20] sm:$0xff]  ;;  %v1406_v16 = vld [vmem:[#allocation7 + $0x18] sm:$0xff]  ;;  %v1405_v18 = vld [vmem:[#allocation7 + $0x10] sm:$0xff] }
  0x21   :  { %v1399_v15 = vld [vmem:[%s2006_s3 + $0x20] sm:$0xff]  ;;  %v1398_v17 = vld [vmem:[%s2006_s3 + $0x18] sm:$0xff]  ;;  %v1397_v19 = vld [vmem:[%s2006_s3 + $0x10] sm:$0xff] }
  0x22   :  { %v1404_v20 = vld [vmem:[#allocation7 + $0x8] sm:$0xff]  ;;  %v1403_v22 = vld [vmem:[#allocation7] sm:$0xff]  ;;  %v1393_v26 = vld [vmem:[#allocation4 + $0x10] sm:$0xff] }
  0x23   :  { %269 = vmatpush.bf16.msra.mxu0 %v1409_v10  ;;  %v1396_v21 = vld [vmem:[%s2006_s3 + $0x8] sm:$0xff]  ;;  %v1395_v23 = vld [vmem:[%s2006_s3] sm:$0xff]  ;;  %v1394_v27 = vld [vmem:[#allocation4 + $0x18] sm:$0xff]  ;;  %s144_s3 = sshll.u32 %s1714_s19, 4  ;;  %s145_s3 = int_to_ptr.vmem [resolvable:$true] %s144_s3 }
  0x24   :  { %346 = vmatpush.bf16.msra.mxu1 %v1401_v11  ;;  %v1391_v24 = vld [vmem:[#allocation4] sm:$0xff]  ;;  %v1392_v25 = vld [vmem:[#allocation4 + $0x8] sm:$0xff]  ;;  %147 = dma.hbm_to_vmem [thread:$0]  %s143_s18, 512, %s145_s3, [#allocation3] }
  0x27   :  { %270 = vmatpush.bf16.msra.mxu0 %v1408_v12 }
  0x28   :  { %347 = vmatpush.bf16.msra.mxu1 %v1400_v13 }
  0x2b   :  { %271 = vmatpush.bf16.msra.mxu0 %v1407_v14 }
  0x2c   :  { %348 = vmatpush.bf16.msra.mxu1 %v1399_v15 }
  0x2f   :  { %272 = vmatpush.bf16.msra.mxu0 %v1406_v16 }
  0x30   :  { %349 = vmatpush.bf16.msra.mxu1 %v1398_v17 }
  0x33   :  { %273 = vmatpush.bf16.msra.mxu0 %v1405_v18 }
  0x34   :  { %350 = vmatpush.bf16.msra.mxu1 %v1397_v19 }
  0x37   :  { %274 = vmatpush.bf16.msra.mxu0 %v1404_v20 }
  0x38   :  { %351 = vmatpush.bf16.msra.mxu1 %v1396_v21 }
  0x3b   :  { %275 = vmatpush.bf16.msra.mxu0 %v1403_v22 }
  0x3c   :  { %352 = vmatpush.bf16.msra.mxu1 %v1395_v23 }
  0x3e   :  { %276 = vmatmul.bf16.vlgmr.msra.gmra.mxu0 %v1391_v24 }
  0x3f   :  { %353 = vmatmul.bf16.vlgmr.msra.gmra.mxu1 %v1391_v24 }
  0x4e   :  { %281 = vmatmul.bf16.gmra.mxu0 %v1392_v25 }
  0x4f   :  { %358 = vmatmul.bf16.gmra.mxu1 %v1392_v25 }
  0x5e   :  { %286 = vmatmul.bf16.gmra.mxu0 %v1393_v26 }
  0x5f   :  { %363 = vmatmul.bf16.gmra.mxu1 %v1393_v26 }
  0x6e   :  { %291 = vmatmul.bf16.gmra.mxu0 %v1394_v27 }
  0x6f   :  { %368 = vmatmul.bf16.gmra.mxu1 %v1394_v27 }
  0xbb   :  { %v1887_v28 = vpop.f32.mrf.mxu0 }
  0xbc   :  { %v354_v29 = vpop.f32.mrf.mxu1 }
  0xc3   :  { %v1889_v30 = vpop.f32.mrf.mxu0 }
  0xc4   :  { %v356_v31 = vpop.f32.mrf.mxu1 }
  0xc5   :  { %v374_v32 = vpack.c.bf16 %v356_v31, %v354_v29 }
  0xcb   :  { %v1891_v33 = vpop.f32.mrf.mxu0 }
  0xcc   :  { %v359_v34 = vpop.f32.mrf.mxu1 }
  0xd3   :  { %v1893_v35 = vpop.f32.mrf.mxu0 }
  0xd4   :  { %v361_v36 = vpop.f32.mrf.mxu1 }
  0xd5   :  { %v375_v37 = vpack.c.bf16 %v361_v36, %v359_v34 }
  0xdb   :  { %v1895_v38 = vpop.f32.mrf.mxu0 }
  0xdc   :  { %v364_v39 = vpop.f32.mrf.mxu1 }
  0xe3   :  { %v1897_v40 = vpop.f32.mrf.mxu0 }
  0xe4   :  { %v366_v41 = vpop.f32.mrf.mxu1 }
  0xe5   :  { %v376_v42 = vpack.c.bf16 %v366_v41, %v364_v39 }
  0xeb   :  { %v1899_v43 = vpop.f32.mrf.mxu0 }
  0xec   :  { %v369_v44 = vpop.f32.mrf.mxu1 }
  0xf3   :  { %v1901_v45 = vpop.f32.mrf.mxu0 }
  0xf4   :  { %v371_v46 = vpop.f32.mrf.mxu1 }
  0xf5   :  { %v377_v47 = vpack.c.bf16 %v371_v46, %v369_v44 }
  0xf7   :  { %428 = vmatpush.bf16.msrb.mxu0 %v377_v47  ;;  %1447 = vmatpush.bf16.msra.mxu2 %v377_v47 }
  0xf8   :  { %1702 = dma.done.wait [#allocation3], 512 }
  0xf9   :  { %1703 = vsyncadd [#allocation3], 4294966784  ;;  %v1715_v48 = vmov 0   ;;  %v1908_v49 = vld [vmem:[#allocation2] sm:$0xff]  ;;  %v1910_v50 = vld [vmem:[#allocation2 + $0x10] sm:$0xff]  ;;  %vm411_vm0 = vcmask 523264  }
  0xfa   :  { %1464 = vset.pattern.permute.xlu0 %v1715_v48  ;;  %1465 = vset.pattern.permute.xlu1 %v1715_v48  ;;  %v1919_v51 = vld [vmem:[#allocation2 + $0x8] sm:$0xff]  ;;  %v1921_v52 = vld [vmem:[#allocation2 + $0x18] sm:$0xff]  ;;  %v1429_v55 = vld [vmem:[#allocation10 + $0x30] sm:$0xff]  ;;  %s1132_s6 = sshll.u32 %s2015_s12, 4  ;;  %s1717_s25 = smov 128   ;;  %s1133_s6 = int_to_ptr.hbm [resolvable:$true] %s1132_s6 }
  0xfb   :  { %455 = vperm.xlu0 %1464, %v1823_v0   ;;  %465 = vperm.xlu1 %1465, %v1833_v2   ;;  %v1430_v53 = vld [vmem:[#allocation10 + $0x38] sm:$0xff]  ;;  %v1421_v56 = vld [vmem:[#allocation9 + $0x30] sm:$0xff]  ;;  %v1428_v57 = vld [vmem:[#allocation10 + $0x28] sm:$0xff]  ;;  %s1718_s26 = smov 8  }
  0xfc   :  { %1466 = vset.pattern.permute.xlu2 %v1715_v48  ;;  %429 = vmatpush.bf16.msrb.mxu0 %v376_v42  ;;  %v1422_v54 = vld [vmem:[#allocation9 + $0x38] sm:$0xff]  ;;  %v1420_v58 = vld [vmem:[#allocation9 + $0x28] sm:$0xff]  ;;  %v1427_v59 = vld [vmem:[#allocation10 + $0x20] sm:$0xff] }
  0xfd   :  { %1448 = vmatpush.bf16.msra.mxu2 %v376_v42  ;;  %475 = vperm.xlu2 %1466, %v1843_v4   ;;  %v1419_v60 = vld [vmem:[#allocation9 + $0x20] sm:$0xff]  ;;  %v1426_v61 = vld [vmem:[#allocation10 + $0x18] sm:$0xff]  ;;  %v1425_v63 = vld [vmem:[#allocation10 + $0x10] sm:$0xff] }
  0xfe   :  { %613 = vmatpush.bf16.msra.mxu3 %v1430_v53  ;;  %v1418_v62 = vld [vmem:[#allocation9 + $0x18] sm:$0xff]  ;;  %v1417_v0 = vld [vmem:[#allocation9 + $0x10] sm:$0xff]  ;;  %v1416_v2 = vld [vmem:[#allocation9 + $0x8] sm:$0xff] }
  0xff   :  { %v1415_v4 = vld [vmem:[#allocation9] sm:$0xff] }
 0x100   :  { %430 = vmatpush.bf16.msrb.mxu0 %v375_v37  ;;  %v1467_v9 = vld [vmem:[%s2008_s5] ss:$0 sm:$0xff] }
 0x101   :  { %1449 = vmatpush.bf16.msra.mxu2 %v375_v37 }
 0x102   :  { %614 = vmatpush.bf16.msra.mxu3 %v1429_v55 }
 0x103   :  { %460 = vperm.xlu0 %1464, %v1828_v1   ;;  %470 = vperm.xlu1 %1465, %v1838_v3   ;;  %v1424_v1 = vld [vmem:[#allocation10 + $0x8] sm:$0xff]  ;;  %v1423_v3 = vld [vmem:[#allocation10] sm:$0xff] }
 0x104   :  { %431 = vmatpush.bf16.msrb.mxu0 %v374_v32 }
 0x105   :  { %1450 = vmatpush.bf16.msra.mxu2 %v374_v32  ;;  %480 = vperm.xlu2 %1466, %v1848_v5  }
 0x106   :  { %615 = vmatpush.bf16.msra.mxu3 %v1428_v57 }
 0x107   :  { %1250 = vmatmul.msk.bf16.vlgmr.msrb.gmra.mxu0 %vm411_vm0, %v1908_v49 }
 0x108   :  { %1252 = vmatmul.msk.bf16.vlgmr.msra.gmra.mxu2 %vm411_vm0, %v1910_v50 }
 0x109   :  { %690 = vmatpush.bf16.msrb.mxu2 %v1422_v54 }
 0x10a   :  { %616 = vmatpush.bf16.msra.mxu3 %v1427_v59 }
 0x10b   :  { %485 = vperm.xlu0 %1464, %v1853_v6   ;;  %490 = vperm.xlu1 %1465, %v1858_v7  }
 0x10d   :  { %691 = vmatpush.bf16.msrb.mxu2 %v1421_v56 }
 0x10e   :  { %617 = vmatpush.bf16.msra.mxu3 %v1426_v61 }
 0x111   :  { %692 = vmatpush.bf16.msrb.mxu2 %v1420_v58 }
 0x112   :  { %618 = vmatpush.bf16.msra.mxu3 %v1425_v63 }
 0x115   :  { %693 = vmatpush.bf16.msrb.mxu2 %v1419_v60 }
 0x116   :  { %619 = vmatpush.bf16.msra.mxu3 %v1424_v1 }
 0x117   :  { %1251 = vmatmul.msk.bf16.gmra.mxu0 %vm411_vm0, %v1919_v51 }
 0x118   :  { %1253 = vmatmul.msk.bf16.gmra.mxu2 %vm411_vm0, %v1921_v52 }
 0x119   :  { %694 = vmatpush.bf16.msrb.mxu2 %v1418_v62 }
 0x11a   :  { %620 = vmatpush.bf16.msra.mxu3 %v1423_v3 }
 0x11d   :  { %695 = vmatpush.bf16.msrb.mxu2 %v1417_v0 }
 0x121   :  { %696 = vmatpush.bf16.msrb.mxu2 %v1416_v2 }
 0x125   :  { %697 = vmatpush.bf16.msrb.mxu2 %v1415_v4 }
 0x157   :  { %v1941_v23 = vpop.permute.xlu2 %475 }
 0x15f   :  { %v1948_v32 = vpop.permute.xlu2 %480 }
 0x16d   :  { %v1927_v5 = vpop.permute.xlu0 %455  ;;  %v1938_v16 = vpop.permute.xlu1 %465 }
 0x175   :  { %v1934_v10 = vpop.permute.xlu0 %460  ;;  %v1944_v25 = vpop.permute.xlu1 %470 }
 0x17d   :  { %v1954_v54 = vpop.permute.xlu1 %490  ;;  %v1957_v57 = vpop.permute.xlu0 %485 }
 0x184   :  { %v433_v6 = vpop.f32.mrf.mxu0 }
 0x185   :  { %v493_v7 = vmul.f32 %v1927_v5, %v433_v6 }
 0x187   :  { %v501_v8 = vadd.f32 %v493_v7, %v1887_v28 }
 0x189   :  { %v512_v13 = vadd.f32 %v1467_v9, %v501_v8 }
 0x18b   :  { %v520_v17 = vmax.f32 %v512_v13, 0.0  ;;  %v443_v19 = vpop.f32.mrf.mxu2  ;;  %v1438_v13 = vld [vmem:[#allocation12 + $0x38] sm:$0xff] }
 0x18c   :  { %v435_v11 = vpop.f32.mrf.mxu0  ;;  %v497_v37 = vmul.f32 %v1941_v23, %v443_v19  ;;  %949 = vmatpush.bf16.msrb.mxu3 %v1438_v13  ;;  %v1443_v19 = vld [vmem:[#allocation13 + $0x20] sm:$0xff] }
 0x18d   :  { %v494_v12 = vmul.f32 %v1934_v10, %v435_v11 }
 0x18e   :  { %v505_v42 = vadd.f32 %v497_v37, %v1895_v38 }
 0x18f   :  { %v502_v14 = vadd.f32 %v494_v12, %v1889_v30  ;;  %v1446_v12 = vld [vmem:[#allocation13 + $0x38] sm:$0xff] }
 0x190   :  { %v516_v46 = vadd.f32 %v1467_v9, %v505_v42  ;;  %872 = vmatpush.bf16.msrb.mxu1 %v1446_v12 }
 0x191   :  { %v513_v15 = vadd.f32 %v1467_v9, %v502_v14  ;;  %v1445_v14 = vld [vmem:[#allocation13 + $0x30] sm:$0xff] }
 0x193   :  { %v521_v18 = vmax.f32 %v513_v15, 0.0  ;;  %v445_v28 = vpop.f32.mrf.mxu2  ;;  %v1437_v15 = vld [vmem:[#allocation12 + $0x30] sm:$0xff] }
 0x194   :  { %v438_v20 = vpop.f32.mrf.mxu0  ;;  %v498_v39 = vmul.f32 %v1948_v32, %v445_v28  ;;  %873 = vmatpush.bf16.msrb.mxu1 %v1445_v14  ;;  %950 = vmatpush.bf16.msrb.mxu3 %v1437_v15  ;;  %v1432_v28 = vld [vmem:[#allocation12 + $0x8] sm:$0xff] }
 0x195   :  { %v528_v21 = vpack.c.bf16 %v521_v18, %v520_v17  ;;  %v495_v22 = vmul.f32 %v1938_v16, %v438_v20  ;;  %v1444_v17 = vld [vmem:[#allocation13 + $0x28] sm:$0xff]  ;;  %v1435_v20 = vld [vmem:[#allocation12 + $0x20] sm:$0xff] }
 0x196   :  { %v506_v44 = vadd.f32 %v498_v39, %v1897_v40  ;;  %v1436_v18 = vld [vmem:[#allocation12 + $0x28] sm:$0xff] }
 0x197   :  { %621 = vmatmul.bf16.vlgmr.msra.gmra.mxu3 %v528_v21  ;;  %698 = vmatmul.bf16.vlgmr.msrb.gmra.mxu2 %v528_v21  ;;  %v503_v24 = vadd.f32 %v495_v22, %v1891_v33  ;;  %v1442_v21 = vld [vmem:[#allocation13 + $0x18] sm:$0xff] }
 0x198   :  { %v517_v47 = vadd.f32 %v1467_v9, %v506_v44  ;;  %874 = vmatpush.bf16.msrb.mxu1 %v1444_v17  ;;  %951 = vmatpush.bf16.msrb.mxu3 %v1436_v18  ;;  %v1434_v22 = vld [vmem:[#allocation12 + $0x18] sm:$0xff] }
 0x199   :  { %v514_v29 = vadd.f32 %v1467_v9, %v503_v24  ;;  %v1441_v24 = vld [vmem:[#allocation13 + $0x10] sm:$0xff] }
 0x19a   :  { %v525_v48 = vmax.f32 %v517_v47, 0.0 }
 0x19b   :  { %v522_v34 = vmax.f32 %v514_v29, 0.0  ;;  %v448_v33 = vpop.f32.mrf.mxu2  ;;  %v1439_v29 = vld [vmem:[#allocation13] sm:$0xff] }
 0x19c   :  { %v440_v26 = vpop.f32.mrf.mxu0  ;;  %v499_v58 = vmul.f32 %v1957_v57, %v448_v33  ;;  %875 = vmatpush.bf16.msrb.mxu1 %v1443_v19  ;;  %952 = vmatpush.bf16.msrb.mxu3 %v1435_v20 }
 0x19d   :  { %v496_v27 = vmul.f32 %v1944_v25, %v440_v26  ;;  %v1433_v26 = vld [vmem:[#allocation12 + $0x10] sm:$0xff] }
 0x19e   :  { %v507_v40 = vadd.f32 %v499_v58, %v1899_v43 }
 0x19f   :  { %v504_v30 = vadd.f32 %v496_v27, %v1893_v35  ;;  %v524_v35 = vmax.f32 %v516_v46, 0.0  ;;  %v1440_v27 = vld [vmem:[#allocation13 + $0x8] sm:$0xff] }
 0x1a0   :  { %v518_v60 = vadd.f32 %v1467_v9, %v507_v40  ;;  %876 = vmatpush.bf16.msrb.mxu1 %v1442_v21  ;;  %953 = vmatpush.bf16.msrb.mxu3 %v1434_v22 }
 0x1a1   :  { %v515_v31 = vadd.f32 %v1467_v9, %v504_v30  ;;  %v530_v56 = vpack.c.bf16 %v525_v48, %v524_v35  ;;  %v1431_v30 = vld [vmem:[#allocation12] sm:$0xff] }
 0x1a2   :  { %v526_v62 = vmax.f32 %v518_v60, 0.0 }
 0x1a3   :  { %v523_v36 = vmax.f32 %v515_v31, 0.0  ;;  %v450_v53 = vpop.f32.mrf.mxu2 }
 0x1a4   :  { %v500_v55 = vmul.f32 %v1954_v54, %v450_v53  ;;  %877 = vmatpush.bf16.msrb.mxu1 %v1441_v24  ;;  %954 = vmatpush.bf16.msrb.mxu3 %v1433_v26 }
 0x1a5   :  { %v529_v41 = vpack.c.bf16 %v523_v36, %v522_v34 }
 0x1a6   :  { %v508_v38 = vadd.f32 %v500_v55, %v1901_v45 }
 0x1a7   :  { %626 = vmatmul.bf16.gmra.mxu3 %v529_v41  ;;  %703 = vmatmul.bf16.gmra.mxu2 %v529_v41  ;;  %v1468_v41 = vld [vmem:[%s2011_s8] ss:$0 sm:$0xff] }
 0x1a8   :  { %v519_v59 = vadd.f32 %v1467_v9, %v508_v38  ;;  %878 = vmatpush.bf16.msrb.mxu1 %v1440_v27  ;;  %955 = vmatpush.bf16.msrb.mxu3 %v1432_v28 }
 0x1aa   :  { %v527_v61 = vmax.f32 %v519_v59, 0.0 }
 0x1ac   :  { %v531_v63 = vpack.c.bf16 %v527_v61, %v526_v62  ;;  %879 = vmatpush.bf16.msrb.mxu1 %v1439_v29  ;;  %956 = vmatpush.bf16.msrb.mxu3 %v1431_v30 }
 0x1b7   :  { %631 = vmatmul.bf16.gmra.mxu3 %v530_v56  ;;  %708 = vmatmul.bf16.gmra.mxu2 %v530_v56 }
 0x1c7   :  { %636 = vmatmul.bf16.gmra.mxu3 %v531_v63  ;;  %713 = vmatmul.bf16.gmra.mxu2 %v531_v63 }
 0x21a   :  { %v699_v0 = vpop.f32.mrf.mxu2  ;;  %v622_v31 = vpop.f32.mrf.mxu3 }
 0x222   :  { %v701_v1 = vpop.f32.mrf.mxu2  ;;  %v624_v34 = vpop.f32.mrf.mxu3 }
 0x223   :  { %v719_v9 = vpack.c.bf16 %v701_v1, %v699_v0 }
 0x22a   :  { %v704_v2 = vpop.f32.mrf.mxu2  ;;  %v627_v33 = vpop.f32.mrf.mxu3 }
 0x232   :  { %v706_v3 = vpop.f32.mrf.mxu2  ;;  %v629_v58 = vpop.f32.mrf.mxu3 }
 0x233   :  { %v720_v43 = vpack.c.bf16 %v706_v3, %v704_v2 }
 0x23a   :  { %v709_v4 = vpop.f32.mrf.mxu2  ;;  %v632_v63 = vpop.f32.mrf.mxu3 }
 0x242   :  { %v711_v6 = vpop.f32.mrf.mxu2 }
 0x243   :  { %v721_v45 = vpack.c.bf16 %v711_v6, %v709_v4 }
 0x24a   :  { %v714_v7 = vpop.f32.mrf.mxu2 }
 0x252   :  { %v716_v8 = vpop.f32.mrf.mxu2 }
 0x253   :  { %v722_v11 = vpack.c.bf16 %v716_v8, %v714_v7  ;;  %v634_v7 = vpop.f32.mrf.mxu3 }
 0x255   :  { %727 = vmatpush.bf16.msra.mxu0 %v722_v11 }
 0x259   :  { %728 = vmatpush.bf16.msra.mxu0 %v721_v45 }
 0x25b   :  { %v637_v15 = vpop.f32.mrf.mxu3 }
 0x25d   :  { %729 = vmatpush.bf16.msra.mxu0 %v720_v43 }
 0x261   :  { %730 = vmatpush.bf16.msra.mxu0 %v719_v9 }
 0x263   :  { %v639_v24 = vpop.f32.mrf.mxu3 }
 0x264   :  { %1318 = vmatmul.msk.bf16.vlgmr.msra.gmra.mxu0 %vm411_vm0, %v1908_v49 }
 0x274   :  { %1319 = vmatmul.msk.bf16.gmra.mxu0 %vm411_vm0, %v1919_v51 }
 0x284   :  { %1320 = vmatmul.msk.bf16.gmra.mxu0 %vm411_vm0, %v1910_v50 }
 0x294   :  { %1321 = vmatmul.msk.bf16.gmra.mxu0 %vm411_vm0, %v1921_v52 }
 0x2e1   :  { %v732_v36 = vpop.f32.mrf.mxu0 }
 0x2e2   :  { %v752_v37 = vmul.f32 %v732_v36, %v1927_v5 }
 0x2e4   :  { %v760_v39 = vadd.f32 %v752_v37, %v622_v31 }
 0x2e6   :  { %v771_v47 = vadd.f32 %v1468_v41, %v760_v39 }
 0x2e8   :  { %v779_v48 = vmax.f32 %v771_v47, 0.0 }
 0x2e9   :  { %v734_v42 = vpop.f32.mrf.mxu0 }
 0x2ea   :  { %v753_v44 = vmul.f32 %v734_v42, %v1934_v10 }
 0x2ec   :  { %v761_v46 = vadd.f32 %v753_v44, %v624_v34 }
 0x2ee   :  { %v772_v35 = vadd.f32 %v1468_v41, %v761_v46 }
 0x2f0   :  { %v780_v53 = vmax.f32 %v772_v35, 0.0 }
 0x2f1   :  { %v737_v55 = vpop.f32.mrf.mxu0 }
 0x2f2   :  { %v787_v56 = vpack.c.bf16 %v780_v53, %v779_v48  ;;  %v754_v38 = vmul.f32 %v737_v55, %v1938_v16 }
 0x2f4   :  { %880 = vmatmul.bf16.vlgmr.msrb.gmra.mxu1 %v787_v56  ;;  %957 = vmatmul.bf16.vlgmr.msrb.gmra.mxu3 %v787_v56  ;;  %v762_v40 = vadd.f32 %v754_v38, %v627_v33  ;;  %v1469_v38 = vld [vmem:[%s2014_s11] ss:$0 sm:$0xff]  ;;  %s1716_s11 = smov [#allocation15]  }
 0x2f5   :  { %s1130_s22 = sshll.u32 %s1716_s11, 4  ;;  %s1131_s22 = int_to_ptr.vmem [resolvable:$true] %s1130_s22 }
 0x2f6   :  { %v773_v62 = vadd.f32 %v1468_v41, %v762_v40 }
 0x2f8   :  { %v781_v1 = vmax.f32 %v773_v62, 0.0 }
 0x2f9   :  { %v739_v59 = vpop.f32.mrf.mxu0 }
 0x2fa   :  { %v755_v60 = vmul.f32 %v739_v59, %v1944_v25 }
 0x2fc   :  { %v763_v61 = vadd.f32 %v755_v60, %v629_v58 }
 0x2fe   :  { %v774_v0 = vadd.f32 %v1468_v41, %v763_v61 }
 0x300   :  { %v782_v2 = vmax.f32 %v774_v0, 0.0 }
 0x301   :  { %v742_v3 = vpop.f32.mrf.mxu0 }
 0x302   :  { %v788_v4 = vpack.c.bf16 %v782_v2, %v781_v1  ;;  %v756_v6 = vmul.f32 %v742_v3, %v1941_v23 }
 0x304   :  { %885 = vmatmul.bf16.gmra.mxu1 %v788_v4  ;;  %962 = vmatmul.bf16.gmra.mxu3 %v788_v4  ;;  %v764_v8 = vadd.f32 %v756_v6, %v632_v63 }
 0x306   :  { %v775_v9 = vadd.f32 %v1468_v41, %v764_v8 }
 0x308   :  { %v783_v13 = vmax.f32 %v775_v9, 0.0 }
 0x309   :  { %v744_v11 = vpop.f32.mrf.mxu0 }
 0x30a   :  { %v757_v45 = vmul.f32 %v744_v11, %v1948_v32 }
 0x30c   :  { %v765_v43 = vadd.f32 %v757_v45, %v634_v7 }
 0x30e   :  { %v776_v12 = vadd.f32 %v1468_v41, %v765_v43 }
 0x310   :  { %v784_v14 = vmax.f32 %v776_v12, 0.0 }
 0x311   :  { %v747_v17 = vpop.f32.mrf.mxu0 }
 0x312   :  { %v789_v18 = vpack.c.bf16 %v784_v14, %v783_v13  ;;  %v758_v19 = vmul.f32 %v747_v17, %v1957_v57 }
 0x314   :  { %890 = vmatmul.bf16.gmra.mxu1 %v789_v18  ;;  %967 = vmatmul.bf16.gmra.mxu3 %v789_v18  ;;  %v766_v20 = vadd.f32 %v758_v19, %v637_v15 }
 0x316   :  { %v777_v27 = vadd.f32 %v1468_v41, %v766_v20 }
 0x318   :  { %v785_v29 = vmax.f32 %v777_v27, 0.0 }
 0x319   :  { %v749_v21 = vpop.f32.mrf.mxu0 }
 0x31a   :  { %v759_v22 = vmul.f32 %v749_v21, %v1954_v54 }
 0x31c   :  { %v767_v26 = vadd.f32 %v759_v22, %v639_v24 }
 0x31e   :  { %v778_v28 = vadd.f32 %v1468_v41, %v767_v26 }
 0x320   :  { %v786_v30 = vmax.f32 %v778_v28, 0.0 }
 0x322   :  { %v790_v31 = vpack.c.bf16 %v786_v30, %v785_v29 }
 0x324   :  { %895 = vmatmul.bf16.gmra.mxu1 %v790_v31  ;;  %972 = vmatmul.bf16.gmra.mxu3 %v790_v31 }
 0x371   :  { %v881_v53 = vpop.f32.mrf.mxu1 }
 0x377   :  { %v958_v34 = vpop.f32.mrf.mxu3 }
 0x379   :  { %v883_v55 = vpop.f32.mrf.mxu1 }
 0x37f   :  { %v960_v36 = vpop.f32.mrf.mxu3 }
 0x380   :  { %v978_v41 = vpack.c.bf16 %v960_v36, %v958_v34 }
 0x381   :  { %v886_v59 = vpop.f32.mrf.mxu1 }
 0x387   :  { %v963_v37 = vpop.f32.mrf.mxu3 }
 0x389   :  { %v888_v63 = vpop.f32.mrf.mxu1 }
 0x38f   :  { %v965_v39 = vpop.f32.mrf.mxu3 }
 0x390   :  { %v979_v48 = vpack.c.bf16 %v965_v39, %v963_v37 }
 0x391   :  { %v891_v4 = vpop.f32.mrf.mxu1 }
 0x397   :  { %v968_v33 = vpop.f32.mrf.mxu3 }
 0x399   :  { %v893_v45 = vpop.f32.mrf.mxu1 }
 0x39f   :  { %v970_v42 = vpop.f32.mrf.mxu3 }
 0x3a0   :  { %v980_v35 = vpack.c.bf16 %v970_v42, %v968_v33 }
 0x3a1   :  { %v896_v13 = vpop.f32.mrf.mxu1 }
 0x3a7   :  { %v973_v44 = vpop.f32.mrf.mxu3 }
 0x3a9   :  { %v898_v19 = vpop.f32.mrf.mxu1 }
 0x3af   :  { %v975_v46 = vpop.f32.mrf.mxu3 }
 0x3b0   :  { %v981_v47 = vpack.c.bf16 %v975_v46, %v973_v44 }
 0x3b2   :  { %986 = vmatpush.bf16.msra.mxu2 %v981_v47 }
 0x3b6   :  { %987 = vmatpush.bf16.msra.mxu2 %v980_v35 }
 0x3ba   :  { %988 = vmatpush.bf16.msra.mxu2 %v979_v48 }
 0x3be   :  { %989 = vmatpush.bf16.msra.mxu2 %v978_v41 }
 0x3c1   :  { %1386 = vmatmul.msk.bf16.vlgmr.msra.gmra.mxu2 %vm411_vm0, %v1908_v49 }
 0x3d1   :  { %1387 = vmatmul.msk.bf16.gmra.mxu2 %vm411_vm0, %v1919_v51 }
 0x3e1   :  { %1388 = vmatmul.msk.bf16.gmra.mxu2 %vm411_vm0, %v1910_v50 }
 0x3f1   :  { %1389 = vmatmul.msk.bf16.gmra.mxu2 %vm411_vm0, %v1921_v52 }
 0x444   :  { %v991_v56 = vpop.f32.mrf.mxu2 }
 0x445   :  { %v1011_v58 = vmul.f32 %v991_v56, %v1927_v5 }
 0x447   :  { %v1019_v40 = vadd.f32 %v1011_v58, %v881_v53 }
 0x449   :  { %v1030_v49 = vadd.f32 %v1469_v38, %v1019_v40 }
 0x44b   :  { %1038 = vmax.xlane.f32.xlu2 %v1030_v49 }
 0x44c   :  { %v993_v51 = vpop.f32.mrf.mxu2 }
 0x44d   :  { %v1012_v60 = vmul.f32 %v993_v51, %v1934_v10 }
 0x44f   :  { %v1020_v50 = vadd.f32 %v1012_v60, %v883_v55 }
 0x451   :  { %v1031_v61 = vadd.f32 %v1469_v38, %v1020_v50 }
 0x453   :  { %1040 = vmax.xlane.f32.xlu0 %v1031_v61 }
 0x454   :  { %v996_v52 = vpop.f32.mrf.mxu2 }
 0x455   :  { %v1013_v62 = vmul.f32 %v996_v52, %v1938_v16 }
 0x457   :  { %v1021_v0 = vadd.f32 %v1013_v62, %v886_v59 }
 0x459   :  { %v1032_v5 = vadd.f32 %v1469_v38, %v1021_v0 }
 0x45b   :  { %1042 = vmax.xlane.f32.xlu1 %v1032_v5 }
 0x45c   :  { %v998_v1 = vpop.f32.mrf.mxu2 }
 0x45d   :  { %v1014_v2 = vmul.f32 %v998_v1, %v1944_v25 }
 0x45f   :  { %v1022_v3 = vadd.f32 %v1014_v2, %v888_v63 }
 0x461   :  { %v1033_v6 = vadd.f32 %v1469_v38, %v1022_v3 }
 0x463   :  { %1044 = vmax.xlane.f32.xlu2 %v1033_v6 }
 0x464   :  { %v1001_v7 = vpop.f32.mrf.mxu2 }
 0x465   :  { %v1015_v10 = vmul.f32 %v1001_v7, %v1941_v23 }
 0x467   :  { %v1023_v8 = vadd.f32 %v1015_v10, %v891_v4 }
 0x469   :  { %v1034_v11 = vadd.f32 %v1469_v38, %v1023_v8 }
 0x46b   :  { %1046 = vmax.xlane.f32.xlu2 %v1034_v11 }
 0x46c   :  { %v1003_v43 = vpop.f32.mrf.mxu2 }
 0x46d   :  { %v1016_v16 = vmul.f32 %v1003_v43, %v1948_v32 }
 0x46f   :  { %v1024_v9 = vadd.f32 %v1016_v16, %v893_v45 }
 0x471   :  { %v1035_v12 = vadd.f32 %v1469_v38, %v1024_v9 }
 0x473   :  { %1048 = vmax.xlane.f32.xlu0 %v1035_v12 }
 0x474   :  { %v1006_v14 = vpop.f32.mrf.mxu2 }
 0x475   :  { %v1017_v25 = vmul.f32 %v1006_v14, %v1957_v57 }
 0x477   :  { %v1025_v15 = vadd.f32 %v1017_v25, %v896_v13 }
 0x479   :  { %v1036_v17 = vadd.f32 %v1469_v38, %v1025_v15 }
 0x47b   :  { %1050 = vmax.xlane.f32.xlu1 %v1036_v17 }
 0x47c   :  { %v1008_v18 = vpop.f32.mrf.mxu2 }
 0x47d   :  { %v1018_v23 = vmul.f32 %v1008_v18, %v1954_v54 }
 0x47f   :  { %v1026_v20 = vadd.f32 %v1018_v23, %v898_v19 }
 0x481   :  { %v1037_v21 = vadd.f32 %v1469_v38, %v1026_v20 }
 0x483   :  { %1052 = vmax.xlane.f32.xlu2 %v1037_v21 }
 0x4be   :  { %v1039_v22 = vpop.xlane.xlu2 %1038 }
 0x4bf   :  { %v1054_v24 = vsub.f32 %v1030_v49, %v1039_v22 }
 0x4c1   :  { %v1062_v32 = vmul.f32 1.442695, %v1054_v24 }
 0x4c3   :  { %1470 = vpow2.f32 %v1062_v32 }
 0x4c6   :  { %v1041_v26 = vpop.xlane.xlu0 %1040 }
 0x4c7   :  { %v1055_v27 = vsub.f32 %v1031_v61, %v1041_v26 }
 0x4c9   :  { %v1471_v28 = vpop.eup %1470  ;;  %v1064_v29 = vmul.f32 1.442695, %v1055_v27 }
 0x4ca   :  { %1078 = vadd.xlane.f32.xlu0 %v1471_v28 }
 0x4cb   :  { %1472 = vpow2.f32 %v1064_v29 }
 0x4ce   :  { %v1043_v57 = vpop.xlane.xlu1 %1042 }
 0x4cf   :  { %v1056_v30 = vsub.f32 %v1032_v5, %v1043_v57 }
 0x4d1   :  { %v1473_v31 = vpop.eup %1472  ;;  %v1066_v34 = vmul.f32 1.442695, %v1056_v30 }
 0x4d2   :  { %1080 = vadd.xlane.f32.xlu1 %v1473_v31 }
 0x4d3   :  { %1474 = vpow2.f32 %v1066_v34 }
 0x4d6   :  { %v1045_v54 = vpop.xlane.xlu2 %1044 }
 0x4d7   :  { %v1057_v36 = vsub.f32 %v1033_v6, %v1045_v54 }
 0x4d9   :  { %v1475_v37 = vpop.eup %1474  ;;  %v1068_v39 = vmul.f32 1.442695, %v1057_v36 }
 0x4da   :  { %1082 = vadd.xlane.f32.xlu2 %v1475_v37 }
 0x4db   :  { %1476 = vpow2.f32 %v1068_v39 }
 0x4de   :  { %v1047_v33 = vpop.xlane.xlu2 %1046 }
 0x4df   :  { %v1058_v42 = vsub.f32 %v1034_v11, %v1047_v33 }
 0x4e1   :  { %v1477_v44 = vpop.eup %1476  ;;  %v1070_v46 = vmul.f32 1.442695, %v1058_v42 }
 0x4e2   :  { %1084 = vadd.xlane.f32.xlu0 %v1477_v44 }
 0x4e3   :  { %1478 = vpow2.f32 %v1070_v46 }
 0x4e6   :  { %v1049_v47 = vpop.xlane.xlu0 %1048 }
 0x4e7   :  { %v1059_v35 = vsub.f32 %v1035_v12, %v1049_v47 }
 0x4e9   :  { %v1479_v48 = vpop.eup %1478  ;;  %v1072_v41 = vmul.f32 1.442695, %v1059_v35 }
 0x4ea   :  { %1086 = vadd.xlane.f32.xlu1 %v1479_v48 }
 0x4eb   :  { %1480 = vpow2.f32 %v1072_v41 }
 0x4ee   :  { %v1051_v53 = vpop.xlane.xlu1 %1050 }
 0x4ef   :  { %v1060_v55 = vsub.f32 %v1036_v17, %v1051_v53 }
 0x4f1   :  { %v1481_v56 = vpop.eup %1480  ;;  %v1074_v58 = vmul.f32 1.442695, %v1060_v55 }
 0x4f2   :  { %1088 = vadd.xlane.f32.xlu2 %v1481_v56 }
 0x4f3   :  { %1482 = vpow2.f32 %v1074_v58 }
 0x4f6   :  { %v1053_v38 = vpop.xlane.xlu2 %1052 }
 0x4f7   :  { %v1061_v40 = vsub.f32 %v1037_v21, %v1053_v38 }
 0x4f9   :  { %v1483_v49 = vpop.eup %1482  ;;  %v1076_v59 = vmul.f32 1.442695, %v1061_v40 }
 0x4fa   :  { %1090 = vadd.xlane.f32.xlu0 %v1483_v49 }
 0x4fb   :  { %1484 = vpow2.f32 %v1076_v59 }
 0x501   :  { %v1485_v51 = vpop.eup %1484 }
 0x502   :  { %1092 = vadd.xlane.f32.xlu1 %v1485_v51 }
 0x53d   :  { %v1079_v60 = vpop.xlane.xlu0 %1078 }
 0x53e   :  { %1486 = vlog2.f32 %v1079_v60 }
 0x544   :  { %v1487_v50 = vpop.eup %1486 }
 0x545   :  { %v1095_v61 = vmul.f32 0.6931472, %v1487_v50  ;;  %v1081_v52 = vpop.xlane.xlu1 %1080 }
 0x546   :  { %1488 = vlog2.f32 %v1081_v52 }
 0x547   :  { %v1110_v62 = vsub.f32 %v1054_v24, %v1095_v61 }
 0x549   :  { %1118 = vst [vmem:[#allocation15] sm:$0xff] %v1110_v62 }
 0x54c   :  { %v1489_v63 = vpop.eup %1488 }
 0x54d   :  { %v1097_v0 = vmul.f32 0.6931472, %v1489_v63  ;;  %v1083_v5 = vpop.xlane.xlu2 %1082 }
 0x54e   :  { %1490 = vlog2.f32 %v1083_v5 }
 0x54f   :  { %v1111_v1 = vsub.f32 %v1055_v27, %v1097_v0 }
 0x551   :  { %1119 = vst [vmem:[#allocation15 + $0x8] sm:$0xff] %v1111_v1 }
 0x554   :  { %v1491_v2 = vpop.eup %1490 }
 0x555   :  { %v1099_v3 = vmul.f32 0.6931472, %v1491_v2  ;;  %v1085_v4 = vpop.xlane.xlu0 %1084 }
 0x556   :  { %1492 = vlog2.f32 %v1085_v4 }
 0x557   :  { %v1112_v6 = vsub.f32 %v1056_v30, %v1099_v3 }
 0x559   :  { %1120 = vst [vmem:[#allocation15 + $0x10] sm:$0xff] %v1112_v6 }
 0x55c   :  { %v1493_v7 = vpop.eup %1492 }
 0x55d   :  { %v1101_v10 = vmul.f32 0.6931472, %v1493_v7  ;;  %v1087_v8 = vpop.xlane.xlu1 %1086 }
 0x55e   :  { %1494 = vlog2.f32 %v1087_v8 }
 0x55f   :  { %v1113_v11 = vsub.f32 %v1057_v36, %v1101_v10 }
 0x561   :  { %1121 = vst [vmem:[#allocation15 + $0x18] sm:$0xff] %v1113_v11 }
 0x564   :  { %v1495_v45 = vpop.eup %1494 }
 0x565   :  { %v1103_v43 = vmul.f32 0.6931472, %v1495_v45  ;;  %v1089_v16 = vpop.xlane.xlu2 %1088 }
 0x566   :  { %1496 = vlog2.f32 %v1089_v16 }
 0x567   :  { %v1114_v9 = vsub.f32 %v1058_v42, %v1103_v43 }
 0x569   :  { %1122 = vst [vmem:[#allocation15 + $0x20] sm:$0xff] %v1114_v9 }
 0x56c   :  { %v1497_v12 = vpop.eup %1496 }
 0x56d   :  { %v1105_v13 = vmul.f32 0.6931472, %v1497_v12  ;;  %v1091_v14 = vpop.xlane.xlu0 %1090 }
 0x56e   :  { %1498 = vlog2.f32 %v1091_v14 }
 0x56f   :  { %v1115_v25 = vsub.f32 %v1059_v35, %v1105_v13 }
 0x571   :  { %1123 = vst [vmem:[#allocation15 + $0x28] sm:$0xff] %v1115_v25 }
 0x574   :  { %v1499_v15 = vpop.eup %1498 }
 0x575   :  { %v1107_v17 = vmul.f32 0.6931472, %v1499_v15  ;;  %v1093_v18 = vpop.xlane.xlu1 %1092 }
 0x576   :  { %1500 = vlog2.f32 %v1093_v18 }
 0x577   :  { %v1116_v23 = vsub.f32 %v1060_v55, %v1107_v17 }
 0x579   :  { %1124 = vst [vmem:[#allocation15 + $0x30] sm:$0xff] %v1116_v23 }
 0x57c   :  { %v1501_v19 = vpop.eup %1500 }
 0x57d   :  { %v1109_v20 = vmul.f32 0.6931472, %v1501_v19 }
 0x57f   :  { %v1117_v21 = vsub.f32 %v1061_v40, %v1109_v20 }
 0x581   :  { %1125 = vst [vmem:[#allocation15 + $0x38] sm:$0xff] %v1117_v21 }
 0x582   :  { %1138 = dma.vmem_to_hbm [thread:$0]  %s1131_s22, 1024, %s1133_s6, [#allocation6], %s1717_s25, %s1717_s25, %s1718_s26  }
 0x583   :  { %1704 = dma.done.wait [#allocation6], 1024  }
 0x584   :  { %1705 = vsyncadd [#allocation6], 4294966272 }
 0x585   :  { %1143 = vsyncpa [#allocation5], 1 }
 0x586   :  { %1144 = vsyncpa [#allocation8], 1 }
 0x587   :  { %1145 = vsyncpa [#allocation11], 1 }
 0x588   :  { %1146 = vsyncpa [#allocation14], 1 }
 0x589   :  { %1147 = vsyncpa [#allocation6], 1 }
 0x58a   :  { %1148 = vsyncmov [#allocation3] }
 0x58d   :  { %s1149_s27 = vpop.sfrf %1148 }
 0x58e   :  { %p1390_p0 = scmp.ne.s32.totalorder %s1149_s27, 0 }
 0x590   :  { %1153 = shalt.err (%p1390_p0)  }

// kernel: tpu_custom_call.1
= control target key start
LH: loop header
LB: loop body
LE: loop exit
PB: predicated region body
PF: predicated region fallthrough
CT: control target
= control target key end

     0   :  { %11 = vsyncpa [#allocation4], 0  ;;  %s1212_s0 = inlined_call_operand.vmem [shape: bf16[128,128], index: 0, kind: input, shape index: {}]   ;;  %s1213_s1 = inlined_call_operand.vmem [shape: bf16[128,128], index: 1, kind: input, shape index: {}]   ;;  %s1214_s2 = inlined_call_operand.hbm [shape: bf16[128,128], index: 2, kind: input, shape index: {}]   ;;  %s1215_s3 = inlined_call_operand.vmem [shape: f32[128,1], index: 3, kind: input, shape index: {}]   ;;  %s1216_s4 = inlined_call_operand.hbm [shape: bf16[128,128], index: 4, kind: input, shape index: {}]   ;;  %s1217_s5 = inlined_call_operand.vmem [shape: f32[1,128], index: 5, kind: input, shape index: {}]   ;;  %s1218_s6 = inlined_call_operand.hbm [shape: bf16[128,128], index: 6, kind: output, shape index: {}]  }
   0x1   :  { %12 = vsyncpa [#allocation7], 0 }
   0x2   :  { %13 = vsyncpa [#allocation5], 0  ;;  %s22_s23 = sshll.u32 %s1214_s2, 4  ;;  %s1024_s24 = smov [#allocation3]   ;;  %s23_s23 = int_to_ptr.hbm [resolvable:$true] %s22_s23 }
   0x3   :  { %s24_s25 = sshll.u32 %s1024_s24, 4  ;;  %s37_s28 = sshll.u32 %s1216_s4, 4  ;;  %s25_s25 = int_to_ptr.vmem [resolvable:$true] %s24_s25  ;;  %s38_s28 = int_to_ptr.hbm [resolvable:$true] %s37_s28 }
   0x4   :  { %s1025_s29 = smov 64   ;;  %s1026_s30 = smov 4  }
   0x5   :  { %30 = dma.hbm_to_vmem [thread:$0]  %s23_s23, 1024, %s25_s25, [#allocation4], %s1025_s29, %s1025_s29, %s1026_s30  }
   0x6   :  { %s1027_s7 = smov [#allocation6]  }
   0x7   :  { %s39_s8 = sshll.u32 %s1027_s7, 4  ;;  %s40_s8 = int_to_ptr.vmem [resolvable:$true] %s39_s8 }
   0x8   :  { %45 = dma.hbm_to_vmem [thread:$0]  %s38_s28, 1024, %s40_s8, [#allocation7], %s1025_s29, %s1025_s29, %s1026_s30  }
   0x9   :  { %1018 = dma.done.wait [#allocation4], 1024  }
   0xa   :  { %1019 = vsyncadd [#allocation4], 4294966272 }
   0xb   :  { %1020 = dma.done.wait [#allocation7], 1024  }
   0xc   :  { %1021 = vsyncadd [#allocation7], 4294966272  ;;  %v1028_v0 = vmov 0   ;;  %v856_v1 = vld [vmem:[%s1213_s1 + $0x38] sm:$0xff]  ;;  %v855_v3 = vld [vmem:[%s1213_s1 + $0x30] sm:$0xff]  ;;  %s699_s24 = sshll.u32 %s1218_s6, 4  ;;  %s700_s24 = int_to_ptr.hbm [resolvable:$true] %s699_s24 }
   0xd   :  { %942 = vset.pattern.permute.xlu0 %v1028_v0  ;;  %943 = vset.pattern.permute.xlu1 %v1028_v0  ;;  %v872_v2 = vld [vmem:[#allocation6 + $0x38] sm:$0xff]  ;;  %v871_v4 = vld [vmem:[#allocation6 + $0x30] sm:$0xff]  ;;  %v320_v5 = vld [vmem:[%s1215_s3] sm:$0xff] }
   0xe   :  { %944 = vset.pattern.permute.xlu2 %v1028_v0  ;;  %220 = vmatpush.bf16.msra.mxu0 %v856_v1  ;;  %v854_v6 = vld [vmem:[%s1213_s1 + $0x28] sm:$0xff]  ;;  %v322_v8 = vld [vmem:[%s1215_s3 + $0x10] sm:$0xff]  ;;  %v853_v9 = vld [vmem:[%s1213_s1 + $0x20] sm:$0xff] }
   0xf   :  { %920 = vmatpush.bf16.msra.mxu2 %v856_v1  ;;  %560 = vmatpush.bf16.msra.mxu1 %v872_v2  ;;  %v870_v7 = vld [vmem:[#allocation6 + $0x28] sm:$0xff]  ;;  %v869_v11 = vld [vmem:[#allocation6 + $0x20] sm:$0xff]  ;;  %v852_v12 = vld [vmem:[%s1213_s1 + $0x18] sm:$0xff] }
  0x10   :  { %928 = vmatpush.bf16.msra.mxu3 %v872_v2  ;;  %338 = vperm.xlu0 %942, %v320_v5   ;;  %v321_v10 = vld [vmem:[%s1215_s3 + $0x8] sm:$0xff]  ;;  %v868_v13 = vld [vmem:[#allocation6 + $0x18] sm:$0xff]  ;;  %v851_v14 = vld [vmem:[%s1213_s1 + $0x10] sm:$0xff] }
  0x11   :  { %348 = vperm.xlu1 %943, %v322_v8   ;;  %v326_v15 = vld [vmem:[%s1215_s3 + $0x30] sm:$0xff]  ;;  %v323_v16 = vld [vmem:[%s1215_s3 + $0x18] sm:$0xff]  ;;  %v324_v17 = vld [vmem:[%s1215_s3 + $0x20] sm:$0xff] }
  0x12   :  { %221 = vmatpush.bf16.msra.mxu0 %v855_v3  ;;  %v867_v18 = vld [vmem:[#allocation6 + $0x10] sm:$0xff]  ;;  %358 = vperm.xlu2 %944, %v324_v17   ;;  %v850_v19 = vld [vmem:[%s1213_s1 + $0x8] sm:$0xff]  ;;  %v327_v21 = vld [vmem:[%s1215_s3 + $0x38] sm:$0xff] }
  0x13   :  { %921 = vmatpush.bf16.msra.mxu2 %v855_v3  ;;  %561 = vmatpush.bf16.msra.mxu1 %v871_v4  ;;  %v866_v20 = vld [vmem:[#allocation6 + $0x8] sm:$0xff]  ;;  %v849_v22 = vld [vmem:[%s1213_s1] sm:$0xff]  ;;  %v330_v31 = vld [vmem:[%s1215_s3 + $0x50] sm:$0xff] }
  0x14   :  { %929 = vmatpush.bf16.msra.mxu3 %v871_v4  ;;  %v329_v23 = vld [vmem:[%s1215_s3 + $0x48] sm:$0xff]  ;;  %v865_v24 = vld [vmem:[#allocation6] sm:$0xff]  ;;  %v335_v34 = vld [vmem:[%s1215_s3 + $0x78] sm:$0xff] }
  0x15   :  { %v841_v25 = vld [vmem:[%s1212_s0] sm:$0xff]  ;;  %v325_v30 = vld [vmem:[%s1215_s3 + $0x28] sm:$0xff]  ;;  %v331_v39 = vld [vmem:[%s1215_s3 + $0x58] sm:$0xff] }
  0x16   :  { %222 = vmatpush.bf16.msra.mxu0 %v854_v6  ;;  %v845_v26 = vld [vmem:[%s1212_s0 + $0x20] sm:$0xff]  ;;  %v333_v33 = vld [vmem:[%s1215_s3 + $0x68] sm:$0xff]  ;;  %v334_v40 = vld [vmem:[%s1215_s3 + $0x70] sm:$0xff] }
  0x17   :  { %922 = vmatpush.bf16.msra.mxu2 %v854_v6  ;;  %562 = vmatpush.bf16.msra.mxu1 %v870_v7  ;;  %v857_v27 = vld [vmem:[#allocation3] sm:$0xff]  ;;  %v842_v35 = vld [vmem:[%s1212_s0 + $0x8] sm:$0xff]  ;;  %v843_v41 = vld [vmem:[%s1212_s0 + $0x10] sm:$0xff] }
  0x18   :  { %930 = vmatpush.bf16.msra.mxu3 %v870_v7  ;;  %343 = vperm.xlu0 %942, %v321_v10   ;;  %v861_v28 = vld [vmem:[#allocation3 + $0x20] sm:$0xff]  ;;  %v846_v36 = vld [vmem:[%s1212_s0 + $0x28] sm:$0xff]  ;;  %v847_v42 = vld [vmem:[%s1212_s0 + $0x30] sm:$0xff] }
  0x19   :  { %353 = vperm.xlu1 %943, %v323_v16   ;;  %v332_v29 = vld [vmem:[%s1215_s3 + $0x60] sm:$0xff]  ;;  %v858_v37 = vld [vmem:[#allocation3 + $0x8] sm:$0xff]  ;;  %v859_v43 = vld [vmem:[#allocation3 + $0x10] sm:$0xff] }
  0x1a   :  { %223 = vmatpush.bf16.msra.mxu0 %v853_v9  ;;  %363 = vperm.xlu2 %944, %v325_v30   ;;  %v328_v32 = vld [vmem:[%s1215_s3 + $0x40] sm:$0xff]  ;;  %v862_v38 = vld [vmem:[#allocation3 + $0x28] sm:$0xff]  ;;  %v863_v44 = vld [vmem:[#allocation3 + $0x30] sm:$0xff] }
  0x1b   :  { %923 = vmatpush.bf16.msra.mxu2 %v853_v9  ;;  %563 = vmatpush.bf16.msra.mxu1 %v869_v11  ;;  %v844_v45 = vld [vmem:[%s1212_s0 + $0x18] sm:$0xff]  ;;  %v1182_v62 = vld [vmem:[%s1217_s5] ss:$0 sm:$0xff]  ;;  %s1029_s5 = smov [#allocation8]  }
  0x1c   :  { %931 = vmatpush.bf16.msra.mxu3 %v869_v11  ;;  %v848_v46 = vld [vmem:[%s1212_s0 + $0x38] sm:$0xff]  ;;  %s697_s21 = sshll.u32 %s1029_s5, 4  ;;  %s698_s21 = int_to_ptr.vmem [resolvable:$true] %s697_s21 }
  0x1d   :  { %v860_v47 = vld [vmem:[#allocation3 + $0x18] sm:$0xff] }
  0x1e   :  { %224 = vmatpush.bf16.msra.mxu0 %v852_v12  ;;  %v864_v48 = vld [vmem:[#allocation3 + $0x38] sm:$0xff] }
  0x1f   :  { %924 = vmatpush.bf16.msra.mxu2 %v852_v12  ;;  %564 = vmatpush.bf16.msra.mxu1 %v868_v13 }
  0x20   :  { %932 = vmatpush.bf16.msra.mxu3 %v868_v13  ;;  %368 = vperm.xlu0 %942, %v326_v15  }
  0x21   :  { %373 = vperm.xlu1 %943, %v327_v21  }
  0x22   :  { %225 = vmatpush.bf16.msra.mxu0 %v851_v14  ;;  %378 = vperm.xlu2 %944, %v328_v32  }
  0x23   :  { %925 = vmatpush.bf16.msra.mxu2 %v851_v14  ;;  %565 = vmatpush.bf16.msra.mxu1 %v867_v18 }
  0x24   :  { %933 = vmatpush.bf16.msra.mxu3 %v867_v18 }
  0x26   :  { %226 = vmatpush.bf16.msra.mxu0 %v850_v19 }
  0x27   :  { %926 = vmatpush.bf16.msra.mxu2 %v850_v19  ;;  %566 = vmatpush.bf16.msra.mxu1 %v866_v20 }
  0x28   :  { %934 = vmatpush.bf16.msra.mxu3 %v866_v20  ;;  %383 = vperm.xlu0 %942, %v329_v23  }
  0x29   :  { %388 = vperm.xlu1 %943, %v330_v31  }
  0x2a   :  { %227 = vmatpush.bf16.msra.mxu0 %v849_v22  ;;  %393 = vperm.xlu2 %944, %v331_v39  }
  0x2b   :  { %927 = vmatpush.bf16.msra.mxu2 %v849_v22  ;;  %567 = vmatpush.bf16.msra.mxu1 %v865_v24 }
  0x2c   :  { %935 = vmatpush.bf16.msra.mxu3 %v865_v24 }
  0x2d   :  { %228 = vmatmul.bf16.vlgmr.msra.gmra.mxu0 %v841_v25 }
  0x2e   :  { %248 = vmatmul.bf16.vlgmr.msra.gmra.mxu2 %v845_v26  ;;  %568 = vmatmul.bf16.vlgmr.msra.gmra.mxu1 %v857_v27 }
  0x2f   :  { %588 = vmatmul.bf16.vlgmr.msra.gmra.mxu3 %v861_v28 }
  0x30   :  { %398 = vperm.xlu0 %942, %v332_v29  }
  0x31   :  { %403 = vperm.xlu1 %943, %v333_v33  }
  0x32   :  { %408 = vperm.xlu2 %944, %v334_v40  }
  0x38   :  { %413 = vperm.xlu0 %942, %v335_v34  }
  0x3d   :  { %233 = vmatmul.bf16.gmra.mxu0 %v842_v35 }
  0x3e   :  { %253 = vmatmul.bf16.gmra.mxu2 %v846_v36  ;;  %573 = vmatmul.bf16.gmra.mxu1 %v858_v37 }
  0x3f   :  { %593 = vmatmul.bf16.gmra.mxu3 %v862_v38 }
  0x4d   :  { %238 = vmatmul.bf16.gmra.mxu0 %v843_v41 }
  0x4e   :  { %258 = vmatmul.bf16.gmra.mxu2 %v847_v42  ;;  %578 = vmatmul.bf16.gmra.mxu1 %v859_v43 }
  0x4f   :  { %598 = vmatmul.bf16.gmra.mxu3 %v863_v44 }
  0x5d   :  { %243 = vmatmul.bf16.gmra.mxu0 %v844_v45 }
  0x5e   :  { %263 = vmatmul.bf16.gmra.mxu2 %v848_v46  ;;  %583 = vmatmul.bf16.gmra.mxu1 %v860_v47 }
  0x5f   :  { %603 = vmatmul.bf16.gmra.mxu3 %v864_v48 }
  0x6c   :  { %v1173_v50 = vpop.permute.xlu2 %358 }
  0x74   :  { %v1175_v53 = vpop.permute.xlu2 %363 }
  0x7c   :  { %v379_v59 = vpop.permute.xlu2 %378 }
  0x82   :  { %v339_v49 = vpop.permute.xlu0 %338 }
  0x83   :  { %v349_v51 = vpop.permute.xlu1 %348 }
  0x84   :  { %v394_v37 = vpop.permute.xlu2 %393 }
  0x8a   :  { %v344_v52 = vpop.permute.xlu0 %343 }
  0x8b   :  { %v354_v56 = vpop.permute.xlu1 %353 }
  0x92   :  { %v1177_v58 = vpop.permute.xlu0 %368 }
  0x93   :  { %v1185_v6 = vpop.permute.xlu1 %373 }
  0x9a   :  { %v384_v9 = vpop.permute.xlu0 %383 }
  0x9b   :  { %v389_v24 = vpop.permute.xlu1 %388 }
  0xaa   :  { %v229_v54 = vpop.f32.mrf.mxu0 }
  0xab   :  { %v569_v55 = vpop.f32.mrf.mxu1  ;;  %v416_v57 = vmul.f32 %v339_v49, %v229_v54 }
  0xad   :  { %v609_v61 = vadd.f32 %v569_v55, %v416_v57 }
  0xaf   :  { %v629_v4 = vadd.f32 %v1182_v62, %v609_v61 }
  0xb1   :  { %v249_v60 = vpop.f32.mrf.mxu2  ;;  %v645_v11 = vmax.f32 %v629_v4, 0.0 }
  0xb2   :  { %v589_v63 = vpop.f32.mrf.mxu3  ;;  %v231_v0 = vpop.f32.mrf.mxu0  ;;  %v424_v1 = vmul.f32 %v379_v59, %v249_v60 }
  0xb3   :  { %v417_v2 = vmul.f32 %v344_v52, %v231_v0  ;;  %v571_v3 = vpop.f32.mrf.mxu1  ;;  %v399_v59 = vpop.permute.xlu0 %398 }
  0xb4   :  { %v617_v7 = vadd.f32 %v589_v63, %v424_v1 }
  0xb5   :  { %v610_v5 = vadd.f32 %v571_v3, %v417_v2 }
  0xb6   :  { %v637_v16 = vadd.f32 %v1182_v62, %v617_v7 }
  0xb7   :  { %v630_v8 = vadd.f32 %v1182_v62, %v610_v5 }
  0xb8   :  { %v653_v22 = vmax.f32 %v637_v16, 0.0 }
  0xb9   :  { %v251_v10 = vpop.f32.mrf.mxu2  ;;  %v646_v12 = vmax.f32 %v630_v8, 0.0 }
  0xba   :  { %v591_v13 = vpop.f32.mrf.mxu3  ;;  %v425_v14 = vmul.f32 %v384_v9, %v251_v10  ;;  %v234_v15 = vpop.f32.mrf.mxu0 }
  0xbb   :  { %v876_v17 = vpack.c.bf16 %v646_v12, %v645_v11  ;;  %v574_v19 = vpop.f32.mrf.mxu1  ;;  %v418_v21 = vmul.f32 %v349_v51, %v234_v15 }
  0xbc   :  { %v618_v18 = vadd.f32 %v591_v13, %v425_v14 }
  0xbd   :  { %877 = vst [vmem:[#allocation8] sm:$0xff] %v876_v17   ;;  %v611_v27 = vadd.f32 %v574_v19, %v418_v21 }
  0xbe   :  { %v638_v20 = vadd.f32 %v1182_v62, %v618_v18 }
  0xbf   :  { %v631_v33 = vadd.f32 %v1182_v62, %v611_v27 }
  0xc0   :  { %v654_v23 = vmax.f32 %v638_v20, 0.0 }
  0xc1   :  { %v254_v25 = vpop.f32.mrf.mxu2  ;;  %v647_v39 = vmax.f32 %v631_v33, 0.0 }
  0xc2   :  { %v896_v26 = vpack.c.bf16 %v654_v23, %v653_v22  ;;  %v594_v28 = vpop.f32.mrf.mxu3  ;;  %v236_v29 = vpop.f32.mrf.mxu0  ;;  %v426_v30 = vmul.f32 %v389_v24, %v254_v25 }
  0xc3   :  { %v419_v31 = vmul.f32 %v354_v56, %v236_v29  ;;  %v576_v32 = vpop.f32.mrf.mxu1  ;;  %v409_v23 = vpop.permute.xlu2 %408 }
  0xc4   :  { %916 = vst [vmem:[#allocation8 + $0x20] sm:$0xff] %v896_v26   ;;  %v619_v35 = vadd.f32 %v594_v28, %v426_v30 }
  0xc5   :  { %v612_v34 = vadd.f32 %v576_v32, %v419_v31 }
  0xc6   :  { %v639_v44 = vadd.f32 %v1182_v62, %v619_v35 }
  0xc7   :  { %v632_v36 = vadd.f32 %v1182_v62, %v612_v34 }
  0xc8   :  { %v655_v51 = vmax.f32 %v639_v44, 0.0 }
  0xc9   :  { %v256_v38 = vpop.f32.mrf.mxu2  ;;  %v648_v40 = vmax.f32 %v632_v36, 0.0 }
  0xca   :  { %v596_v41 = vpop.f32.mrf.mxu3  ;;  %v427_v42 = vmul.f32 %v394_v37, %v256_v38  ;;  %v239_v43 = vpop.f32.mrf.mxu0 }
  0xcb   :  { %v881_v45 = vpack.c.bf16 %v648_v40, %v647_v39  ;;  %v579_v47 = vpop.f32.mrf.mxu1  ;;  %v420_v49 = vmul.f32 %v1173_v50, %v239_v43  ;;  %v404_v50 = vpop.permute.xlu1 %403 }
  0xcc   :  { %v620_v46 = vadd.f32 %v596_v41, %v427_v42 }
  0xcd   :  { %913 = vst [vmem:[#allocation8 + $0x8] sm:$0xff] %v881_v45   ;;  %v613_v56 = vadd.f32 %v579_v47, %v420_v49 }
  0xce   :  { %v640_v48 = vadd.f32 %v1182_v62, %v620_v46 }
  0xcf   :  { %v633_v1 = vadd.f32 %v1182_v62, %v613_v56 }
  0xd0   :  { %v656_v52 = vmax.f32 %v640_v48, 0.0 }
  0xd1   :  { %v259_v54 = vpop.f32.mrf.mxu2  ;;  %v649_v7 = vmax.f32 %v633_v1, 0.0 }
  0xd2   :  { %v901_v55 = vpack.c.bf16 %v656_v52, %v655_v51  ;;  %v599_v57 = vpop.f32.mrf.mxu3  ;;  %v241_v60 = vpop.f32.mrf.mxu0  ;;  %v428_v61 = vmul.f32 %v399_v59, %v259_v54 }
  0xd3   :  { %v421_v63 = vmul.f32 %v1175_v53, %v241_v60  ;;  %v581_v0 = vpop.f32.mrf.mxu1 }
  0xd4   :  { %917 = vst [vmem:[#allocation8 + $0x28] sm:$0xff] %v901_v55   ;;  %v621_v3 = vadd.f32 %v599_v57, %v428_v61 }
  0xd5   :  { %v614_v2 = vadd.f32 %v581_v0, %v421_v63 }
  0xd6   :  { %v641_v12 = vadd.f32 %v1182_v62, %v621_v3 }
  0xd7   :  { %v634_v4 = vadd.f32 %v1182_v62, %v614_v2 }
  0xd8   :  { %v657_v17 = vmax.f32 %v641_v12, 0.0 }
  0xd9   :  { %v261_v5 = vpop.f32.mrf.mxu2  ;;  %v650_v8 = vmax.f32 %v634_v4, 0.0 }
  0xda   :  { %v429_v9 = vmul.f32 %v404_v50, %v261_v5  ;;  %v601_v10 = vpop.f32.mrf.mxu3  ;;  %v244_v11 = vpop.f32.mrf.mxu0 }
  0xdb   :  { %v886_v13 = vpack.c.bf16 %v650_v8, %v649_v7  ;;  %v584_v15 = vpop.f32.mrf.mxu1  ;;  %v422_v16 = vmul.f32 %v1177_v58, %v244_v11  ;;  %v414_v58 = vpop.permute.xlu0 %413 }
  0xdc   :  { %v622_v14 = vadd.f32 %v601_v10, %v429_v9 }
  0xdd   :  { %914 = vst [vmem:[#allocation8 + $0x10] sm:$0xff] %v886_v13   ;;  %v615_v21 = vadd.f32 %v584_v15, %v422_v16 }
  0xde   :  { %v642_v53 = vadd.f32 %v1182_v62, %v622_v14 }
  0xdf   :  { %v635_v28 = vadd.f32 %v1182_v62, %v615_v21 }
  0xe0   :  { %v658_v18 = vmax.f32 %v642_v53, 0.0 }
  0xe1   :  { %v264_v19 = vpop.f32.mrf.mxu2  ;;  %v651_v33 = vmax.f32 %v635_v28, 0.0 }
  0xe2   :  { %v906_v20 = vpack.c.bf16 %v658_v18, %v657_v17  ;;  %v604_v22 = vpop.f32.mrf.mxu3  ;;  %v246_v24 = vpop.f32.mrf.mxu0  ;;  %v430_v25 = vmul.f32 %v409_v23, %v264_v19 }
  0xe3   :  { %v423_v26 = vmul.f32 %v1185_v6, %v246_v24  ;;  %v586_v27 = vpop.f32.mrf.mxu1 }
  0xe4   :  { %918 = vst [vmem:[#allocation8 + $0x30] sm:$0xff] %v906_v20   ;;  %v623_v30 = vadd.f32 %v604_v22, %v430_v25 }
  0xe5   :  { %v616_v29 = vadd.f32 %v586_v27, %v423_v26 }
  0xe6   :  { %v643_v37 = vadd.f32 %v1182_v62, %v623_v30 }
  0xe7   :  { %v636_v31 = vadd.f32 %v1182_v62, %v616_v29 }
  0xe8   :  { %v659_v40 = vmax.f32 %v643_v37, 0.0 }
  0xe9   :  { %v266_v32 = vpop.f32.mrf.mxu2  ;;  %v652_v34 = vmax.f32 %v636_v31, 0.0 }
  0xea   :  { %v431_v35 = vmul.f32 %v414_v58, %v266_v32  ;;  %v606_v36 = vpop.f32.mrf.mxu3 }
  0xeb   :  { %v891_v38 = vpack.c.bf16 %v652_v34, %v651_v33 }
  0xec   :  { %v624_v39 = vadd.f32 %v606_v36, %v431_v35 }
  0xed   :  { %915 = vst [vmem:[#allocation8 + $0x18] sm:$0xff] %v891_v38  }
  0xee   :  { %v644_v6 = vadd.f32 %v1182_v62, %v624_v39 }
  0xf0   :  { %v660_v41 = vmax.f32 %v644_v6, 0.0 }
  0xf2   :  { %v911_v42 = vpack.c.bf16 %v660_v41, %v659_v40 }
  0xf4   :  { %919 = vst [vmem:[#allocation8 + $0x38] sm:$0xff] %v911_v42  }
  0xf5   :  { %705 = dma.vmem_to_hbm [thread:$0]  %s698_s21, 1024, %s700_s24, [#allocation5], %s1025_s29, %s1025_s29, %s1026_s30  }
  0xf6   :  { %1022 = dma.done.wait [#allocation5], 1024  }
  0xf7   :  { %1023 = vsyncadd [#allocation5], 4294966272 }
  0xf8   :  { %710 = vsyncpa [#allocation4], 1 }
  0xf9   :  { %711 = vsyncpa [#allocation7], 1 }
  0xfa   :  { %712 = vsyncpa [#allocation5], 1 }

</bundles_post_ra>
